<compile_context>
chip_gen: v5e
topology: v5e:2x2
jax: 0.10.0
libtpu: 0.0.40
codegen_flags: <defaults>
</compile_context>

<pallas_src>
import functools

import jax
import jax.numpy as jnp
from jax.experimental import pallas as pl
from jax.experimental.pallas import tpu as pltpu

# ----------------------------- model hyper-params ---------------------------
BATCH = 2
CHANNELS = 3
IMG_H = IMG_W = 16
PATCH = 8                      # patch size
MAX_PATCHES = 8                # padded patch sequence length
PATCH_DIM = CHANNELS * PATCH * PATCH   # 192
HIDDEN = 32
NUM_HEADS = 4
HEAD_DIM = HIDDEN // NUM_HEADS
D_FF = 64
VOCAB = 64
NUM_ENC_LAYERS = 2
NUM_DEC_LAYERS = 2
MAX_NEW_TOKENS = 4             # stands in for max_new_tokens=1024
REL_BUCKETS = 8
REL_MAX_DIST = 16
MAX_ROWS_COLS = 16             # row / column embedding table size
NEG_INF = -1e9


# --------------------------- in-kernel helpers --------------------------------
def _rms(x, w):
    # Pix2StructLayerNorm == T5 RMSNorm (no mean subtraction); f32 math.
    var = jnp.mean(x * x, axis=-1, keepdims=True)
    return x * jax.lax.rsqrt(var + 1e-6) * w


def _attn_all_heads(q_all, k_all, v_all, wo, bias_fn):
    """T5 / Pix2Struct attention (NO 1/sqrt(d) scaling), all heads in one call.

    q_all [Sq, D], k_all/v_all [Sk, D] (f32); wo bf16 [D, D];
    bias_fn(head) -> f32 additive bias broadcastable to [Sq, Sk].
    Heads are sliced out of the lane dim (no transposes / HBM round-trips).
    """
    outs = []
    for h in range(NUM_HEADS):
        sl = slice(h * HEAD_DIM, (h + 1) * HEAD_DIM)
        qh = q_all[:, sl].astype(jnp.bfloat16)
        kh = k_all[:, sl].astype(jnp.bfloat16)
        vh = v_all[:, sl].astype(jnp.bfloat16)
        # q @ k^T via dot_general (contract on head_dim of both operands).
        s = jax.lax.dot_general(qh, kh, (((1,), (1,)), ((), ())),
                                preferred_element_type=jnp.float32)
        s = s + bias_fn(h)                                   # f32 bias add
        s = s - jnp.max(s, axis=-1, keepdims=True)
        p = jnp.exp(s)
        p = p * pl.reciprocal(jnp.sum(p, axis=-1, keepdims=True), approx=True)
        outs.append(jnp.dot(p.astype(jnp.bfloat16), vh,
                            preferred_element_type=jnp.float32))
    o = jnp.concatenate(outs, axis=-1)                       # [Sq, D]
    return jnp.dot(o.astype(jnp.bfloat16), wo,
                   preferred_element_type=jnp.float32)


def _glu_mlp_body(x, wi, wo):
    # gelu_new(x @ wi_0) * (x @ wi_1) @ wo, with wi_0|wi_1 fused (lane-dense 128).
    hh = jnp.dot(x.astype(jnp.bfloat16), wi, preferred_element_type=jnp.float32)
    g = jax.nn.gelu(hh[:, :D_FF], approximate=True) * hh[:, D_FF:]
    return jnp.dot(g.astype(jnp.bfloat16), wo, preferred_element_type=jnp.float32)


# ------------------------------- Pallas kernels ------------------------------
def _matmul_kernel(x_ref, w_ref, o_ref):
    o_ref[...] = jnp.dot(x_ref[...].astype(jnp.bfloat16),
                         w_ref[...].astype(jnp.bfloat16),
                         preferred_element_type=jnp.float32)


def _rmsnorm_kernel(x_ref, w_ref, o_ref):
    o_ref[...] = _rms(x_ref[...].astype(jnp.float32), w_ref[...])


def _final_head_kernel(x_ref, ln_ref, w_ref, o_ref):
    # fused final RMSNorm + LM head projection
    xn = _rms(x_ref[...].astype(jnp.float32), ln_ref[...])
    o_ref[...] = jnp.dot(xn.astype(jnp.bfloat16), w_ref[...],
                         preferred_element_type=jnp.float32)


def _encoder_layer_kernel(h_ref, mask_ref,
                          ln1_ref, wqkv_ref, wo_a_ref,
                          ln2_ref, wi_ref, wo_m_ref,
                          o_ref):
    # One full encoder layer per grid step (one batch element).
    x = h_ref[0].astype(jnp.float32)                         # [S, D]
    key_bias = (1.0 - mask_ref[0]) * NEG_INF                 # [1, S] built in-kernel

    # --- self attention ---
    xn = _rms(x, ln1_ref[...])
    qkv = jnp.dot(xn.astype(jnp.bfloat16), wqkv_ref[...],
                  preferred_element_type=jnp.float32)        # [S, 3D]
    attn = _attn_all_heads(qkv[:, :HIDDEN], qkv[:, HIDDEN:2 * HIDDEN],
                           qkv[:, 2 * HIDDEN:], wo_a_ref[...],
                           lambda hh: key_bias)
    x = x + attn

    # --- GLU MLP ---
    xn = _rms(x, ln2_ref[...])
    x = x + _glu_mlp_body(xn, wi_ref[...], wo_m_ref[...])

    o_ref[0] = x


def _decoder_layer_kernel(h_ref, enc_ref, mask_ref, sbias_ref,
                          ln1_ref, wqkv_ref, wo_s_ref,
                          ln2_ref, wq_c_ref, wkv_c_ref, wo_c_ref,
                          ln3_ref, wi_ref, wo_m_ref,
                          o_ref):
    # One full decoder block per grid step (one batch element).
    x = h_ref[0].astype(jnp.float32)                         # [T, D]
    enc = enc_ref[0].astype(jnp.float32)                     # [S, D]
    key_bias = (1.0 - mask_ref[0]) * NEG_INF                 # [1, S]

    # --- self attention (rel-pos + causal bias passed compact as [H,T,T]) ---
    xn = _rms(x, ln1_ref[...])
    qkv = jnp.dot(xn.astype(jnp.bfloat16), wqkv_ref[...],
                  preferred_element_type=jnp.float32)        # [T, 3D]
    attn = _attn_all_heads(qkv[:, :HIDDEN], qkv[:, HIDDEN:2 * HIDDEN],
                           qkv[:, 2 * HIDDEN:], wo_s_ref[...],
                           lambda hh: sbias_ref[hh])
    x = x + attn

    # --- cross attention (fused KV projection of encoder states) ---
    # TODO(synk): cross-attn K/V are encoder-only and could be cached per layer.
    xn = _rms(x, ln2_ref[...])
    q = jnp.dot(xn.astype(jnp.bfloat16), wq_c_ref[...],
                preferred_element_type=jnp.float32)          # [T, D]
    kv = jnp.dot(enc.astype(jnp.bfloat16), wkv_c_ref[...],
                 preferred_element_type=jnp.float32)         # [S, 2D]
    attn = _attn_all_heads(q, kv[:, :HIDDEN], kv[:, HIDDEN:], wo_c_ref[...],
                           lambda hh: key_bias)
    x = x + attn

    # --- GLU MLP ---
    xn = _rms(x, ln3_ref[...])
    x = x + _glu_mlp_body(xn, wi_ref[...], wo_m_ref[...])

    o_ref[0] = x


# ------------------------------ Pallas wrappers -------------------------------
def linear(x, w, b=None):
    lead = x.shape[:-1]
    x2 = x.reshape(-1, x.shape[-1])
    M, K = x2.shape
    N = w.shape[1]
    out = pl.pallas_call(
        _matmul_kernel,
        grid=(1,),
        in_specs=[pl.BlockSpec((M, K), lambda i: (0, 0)),
                  pl.BlockSpec((K, N), lambda i: (0, 0))],
        out_specs=pl.BlockSpec((M, N), lambda i: (0, 0)),
        out_shape=jax.ShapeDtypeStruct((M, N), jnp.float32),
    )(x2, w)
    if b is not None:
        out = out + b
    return out.reshape(*lead, N)


def rmsnorm(x, w):
    lead = x.shape[:-1]
    D = x.shape[-1]
    x2 = x.reshape(-1, D).astype(jnp.float32)
    M = x2.shape[0]
    out = pl.pallas_call(
        _rmsnorm_kernel,
        grid=(1,),
        in_specs=[pl.BlockSpec((M, D), lambda i: (0, 0)),
                  pl.BlockSpec((1, D), lambda i: (0, 0))],
        out_specs=pl.BlockSpec((M, D), lambda i: (0, 0)),
        out_shape=jax.ShapeDtypeStruct((M, D), jnp.float32),
    )(x2, w.reshape(1, D))
    return out.reshape(*lead, D)


def encoder_layer(h, mask3, lp):
    B, S, D = h.shape
    return pl.pallas_call(
        _encoder_layer_kernel,
        grid=(B,),
        in_specs=[
            pl.BlockSpec((1, S, D), lambda b: (b, 0, 0)),
            pl.BlockSpec((1, 1, S), lambda b: (b, 0, 0)),
            pl.BlockSpec((1, D), lambda b: (0, 0)),
            pl.BlockSpec((D, 3 * D), lambda b: (0, 0)),
            pl.BlockSpec((D, D), lambda b: (0, 0)),
            pl.BlockSpec((1, D), lambda b: (0, 0)),
            pl.BlockSpec((D, 2 * D_FF), lambda b: (0, 0)),
            pl.BlockSpec((D_FF, D), lambda b: (0, 0)),
        ],
        out_specs=pl.BlockSpec((1, S, D), lambda b: (b, 0, 0)),
        out_shape=jax.ShapeDtypeStruct((B, S, D), jnp.float32),
        compiler_params=pltpu.CompilerParams(dimension_semantics=("parallel",)),
    )(h, mask3, lp["ln1"], lp["wqkv"], lp["wo_attn"],
      lp["ln2"], lp["wi"], lp["wo_mlp"])


def decoder_layer(h, enc_h, mask3, self_bias, lp):
    B, T, D = h.shape
    S = enc_h.shape[1]
    return pl.pallas_call(
        _decoder_layer_kernel,
        grid=(B,),
        in_specs=[
            pl.BlockSpec((1, T, D), lambda b: (b, 0, 0)),
            pl.BlockSpec((1, S, D), lambda b: (b, 0, 0)),
            pl.BlockSpec((1, 1, S), lambda b: (b, 0, 0)),
            pl.BlockSpec((NUM_HEADS, T, T), lambda b: (0, 0, 0)),
            pl.BlockSpec((1, D), lambda b: (0, 0)),
            pl.BlockSpec((D, 3 * D), lambda b: (0, 0)),
            pl.BlockSpec((D, D), lambda b: (0, 0)),
            pl.BlockSpec((1, D), lambda b: (0, 0)),
            pl.BlockSpec((D, D), lambda b: (0, 0)),
            pl.BlockSpec((D, 2 * D), lambda b: (0, 0)),
            pl.BlockSpec((D, D), lambda b: (0, 0)),
            pl.BlockSpec((1, D), lambda b: (0, 0)),
            pl.BlockSpec((D, 2 * D_FF), lambda b: (0, 0)),
            pl.BlockSpec((D_FF, D), lambda b: (0, 0)),
        ],
        out_specs=pl.BlockSpec((1, T, D), lambda b: (b, 0, 0)),
        out_shape=jax.ShapeDtypeStruct((B, T, D), jnp.float32),
        compiler_params=pltpu.CompilerParams(dimension_semantics=("parallel",)),
    )(h, enc_h, mask3, self_bias,
      lp["ln1"], lp["wqkv_self"], lp["wo_self"],
      lp["ln2"], lp["wq_cross"], lp["wkv_cross"], lp["wo_cross"],
      lp["ln3"], lp["wi"], lp["wo_mlp"])


def final_norm_lm_head(h, ln, lm_head):
    B, T, D = h.shape
    V = lm_head.shape[1]
    x2 = h.reshape(B * T, D)
    out = pl.pallas_call(
        _final_head_kernel,
        grid=(1,),
        in_specs=[pl.BlockSpec((B * T, D), lambda i: (0, 0)),
                  pl.BlockSpec((1, D), lambda i: (0, 0)),
                  pl.BlockSpec((D, V), lambda i: (0, 0))],
        out_specs=pl.BlockSpec((B * T, V), lambda i: (0, 0)),
        out_shape=jax.ShapeDtypeStruct((B * T, V), jnp.float32),
    )(x2, ln.reshape(1, D), lm_head)
    return out.reshape(B, T, V)


# ------------------------ image processor (plain-JAX glue) -------------------
def image_to_flattened_patches(image_nchw):
    """Mirrors Pix2StructImageProcessor: per-image standardization + patchify +
    [row_id+1, col_id+1, flat_patch] concatenation, padded to MAX_PATCHES."""
    B, C, H, W = image_nchw.shape
    x = image_nchw.astype(jnp.float32)
    mean = x.mean(axis=(1, 2, 3), keepdims=True)
    std = x.std(axis=(1, 2, 3), keepdims=True, ddof=1)   # unbiased, like torch.std
    adj = jnp.maximum(std, 1.0 / jnp.sqrt(jnp.float32(C * H * W)))
    x = (x - mean) / adj
    # TODO(synk): the HF processor dynamically resizes to fill max_patches; we
    # assume H, W are already multiples of the patch size.
    rows, cols = H // PATCH, W // PATCH
    patches = x.reshape(B, C, rows, PATCH, cols, PATCH)
    patches = patches.transpose(0, 2, 4, 1, 3, 5).reshape(
        B, rows * cols, C * PATCH * PATCH)
    row_ids = jnp.tile(jnp.arange(rows)[:, None], (1, cols)).reshape(-1) + 1
    col_ids = jnp.tile(jnp.arange(cols)[None, :], (rows, 1)).reshape(-1) + 1
    ids = jnp.stack(
        [jnp.broadcast_to(row_ids, (B, rows * cols)),
         jnp.broadcast_to(col_ids, (B, rows * cols))],
        axis=-1).astype(jnp.float32)
    fp = jnp.concatenate([ids, patches], axis=-1)
    n = rows * cols
    pad = MAX_PATCHES - n
    fp = jnp.pad(fp, ((0, 0), (0, pad), (0, 0)))
    mask = jnp.pad(jnp.ones((B, n), jnp.float32), ((0, 0), (0, pad)))
    return fp, mask


# ---------------------------------- encoder ----------------------------------
def encode(params, flattened_patches, attention_mask):
    row_ids = flattened_patches[:, :, 0].astype(jnp.int32)
    col_ids = flattened_patches[:, :, 1].astype(jnp.int32)
    pix = flattened_patches[:, :, 2:]

    e = params["enc"]
    h = linear(pix, e["patch_proj_w"], e["patch_proj_b"])
    h = h + jnp.take(e["row_emb"], row_ids, axis=0)
    h = h + jnp.take(e["col_emb"], col_ids, axis=0)

    mask3 = attention_mask[:, None, :]      # compact [B, 1, S]; bias built in-kernel
    for lp in e["layers"]:
        h = encoder_layer(h, mask3, lp)
    return rmsnorm(h, e["final_ln"]), mask3


# ---------------------------------- decoder ----------------------------------
def relative_position_bias(table, T):
    """T5 decoder (unidirectional) bucketed relative-position bias -> [H, T, T]."""
    ctx = jnp.arange(T)[:, None]
    mem = jnp.arange(T)[None, :]
    rel = mem - ctx
    rel = -jnp.minimum(rel, 0)
    max_exact = REL_BUCKETS // 2
    is_small = rel < max_exact
    rel_f = jnp.maximum(rel.astype(jnp.float32), 1.0)
    large = max_exact + (
        jnp.log(rel_f / max_exact)
        / jnp.log(REL_MAX_DIST / max_exact)
        * (REL_BUCKETS - max_exact)
    ).astype(jnp.int32)
    large = jnp.minimum(large, REL_BUCKETS - 1)
    buckets = jnp.where(is_small, rel, large)
    bias = jnp.take(table, buckets, axis=0)      # [T, T, H]
    return bias.transpose(2, 0, 1)               # [H, T, T]


def decode(params, enc_h, enc_mask3, self_bias, dec_ids):
    d = params["dec"]
    h = jnp.take(d["tok_emb"], dec_ids, axis=0)  # [B, T, HIDDEN]
    for lp in d["layers"]:
        h = decoder_layer(h, enc_h, enc_mask3, self_bias, lp)
    return final_norm_lm_head(h, d["final_ln"], d["lm_head"])   # [B, T, VOCAB]


@functools.partial(jax.jit, static_argnames=("max_new_tokens",))
def generate(params, image_nchw, max_new_tokens=MAX_NEW_TOKENS):
    """model.generate(...) equivalent: greedy decoding, fixed number of steps."""
    fp, mask = image_to_flattened_patches(image_nchw)
    enc_h, mask3 = encode(params, fp, mask)
    B = image_nchw.shape[0]
    T = max_new_tokens + 1

    # hoisted out of the generation loop (depend only on T and fixed params)
    rel = relative_position_bias(params["dec"]["rel_emb"], T)   # [H, T, T]
    causal = jnp.tril(jnp.ones((T, T), jnp.float32))
    self_bias = rel + (1.0 - causal)[None] * NEG_INF            # [H, T, T]

    ids0 = jnp.zeros((B, T), jnp.int32)     # decoder_start_token_id = 0 (<pad>)

    # TODO(synk): real generation would use a KV cache; with T fixed and causal
    # masking, full re-decode per step gives identical greedy tokens.
    def step(t, ids):
        logits = decode(params, enc_h, mask3, self_bias, ids)
        logit_t = jax.lax.dynamic_slice_in_dim(logits, t, 1, axis=1)[:, 0, :]
        nxt = jnp.argmax(logit_t, axis=-1).astype(jnp.int32)
        return jax.lax.dynamic_update_slice_in_dim(ids, nxt[:, None], t + 1, axis=1)

    ids = jax.lax.fori_loop(0, max_new_tokens, step, ids0)
    final_logits = decode(params, enc_h, mask3, self_bias, ids)
    # TODO(synk): no_repeat_ngram_size=20, max_time wall-clock stop, EOS early
    # stopping and tokenizer batch_decode / latex post-processing have no Pallas
    # equivalent (string ops); we return token ids instead.
    return ids, final_logits


# ------------------------------ parameter init --------------------------------
def init_params(key):
    def nrm(k, shape, scale=0.02, dtype=jnp.bfloat16):
        return (scale * jax.random.normal(k, shape)).astype(dtype)

    def ones(shape):
        return jnp.ones(shape, jnp.float32)

    keys = iter(jax.random.split(key, 256))

    enc_layers = [{
        "ln1": ones((1, HIDDEN)),
        "wqkv": nrm(next(keys), (HIDDEN, 3 * HIDDEN)),        # fused Q|K|V
        "wo_attn": nrm(next(keys), (HIDDEN, HIDDEN)),
        "ln2": ones((1, HIDDEN)),
        "wi": nrm(next(keys), (HIDDEN, 2 * D_FF)),            # fused wi_0|wi_1
        "wo_mlp": nrm(next(keys), (D_FF, HIDDEN)),
    } for _ in range(NUM_ENC_LAYERS)]

    dec_layers = [{
        "ln1": ones((1, HIDDEN)),
        "wqkv_self": nrm(next(keys), (HIDDEN, 3 * HIDDEN)),   # fused Q|K|V
        "wo_self": nrm(next(keys), (HIDDEN, HIDDEN)),
        "ln2": ones((1, HIDDEN)),
        "wq_cross": nrm(next(keys), (HIDDEN, HIDDEN)),
        "wkv_cross": nrm(next(keys), (HIDDEN, 2 * HIDDEN)),   # fused K|V
        "wo_cross": nrm(next(keys), (HIDDEN, HIDDEN)),
        "ln3": ones((1, HIDDEN)),
        "wi": nrm(next(keys), (HIDDEN, 2 * D_FF)),            # fused wi_0|wi_1
        "wo_mlp": nrm(next(keys), (D_FF, HIDDEN)),
    } for _ in range(NUM_DEC_LAYERS)]

    return {
        "enc": {
            "patch_proj_w": nrm(next(keys), (PATCH_DIM, HIDDEN)),
            "patch_proj_b": nrm(next(keys), (HIDDEN,), dtype=jnp.float32),
            "row_emb": nrm(next(keys), (MAX_ROWS_COLS, HIDDEN), dtype=jnp.float32),
            "col_emb": nrm(next(keys), (MAX_ROWS_COLS, HIDDEN), dtype=jnp.float32),
            "layers": enc_layers,
            "final_ln": ones((HIDDEN,)),
        },
        "dec": {
            "tok_emb": nrm(next(keys), (VOCAB, HIDDEN), dtype=jnp.float32),
            "rel_emb": nrm(next(keys), (REL_BUCKETS, NUM_HEADS), dtype=jnp.float32),
            "layers": dec_layers,
            "final_ln": ones((HIDDEN,)),
            "lm_head": nrm(next(keys), (HIDDEN, VOCAB)),
        },
    }


# ----------------------------------- main -------------------------------------
if __name__ == "__main__":
    key = jax.random.PRNGKey(0)
    k_img, k_params = jax.random.split(key)
    # NCHW image, matching PyTorch conv / image-processor convention.
    image = jax.random.uniform(k_img, (BATCH, CHANNELS, IMG_H, IMG_W),
                               dtype=jnp.float32)
    params = init_params(k_params)

    token_ids, final_logits = generate(params, image)
    token_ids = jax.block_until_ready(token_ids)
    assert token_ids.shape == (BATCH, MAX_NEW_TOKENS + 1)
    assert bool(jnp.all(jnp.isfinite(final_logits)))
    assert bool(jnp.all((token_ids >= 0) & (token_ids < VOCAB)))
    print("KERNEL_OK")
</pallas_src>

<mosaic_0001>
module attributes {stable_mosaic.version = 11 : i64} {
  func.func @_rmsnorm_kernel(%arg0: i32, %arg1: memref<16x32xf32, #tpu.memory_space<vmem>>, %arg2: memref<1x32xf32, #tpu.memory_space<vmem>>, %arg3: memref<16x32xf32, #tpu.memory_space<vmem>>) attributes {dimension_semantics = [#tpu.dimension_semantics<arbitrary>], iteration_bounds = array<i64: 1>, scalar_prefetch = 0 : i64, scratch_operands = 0 : i64, tpu.core_type = #tpu.core_type<tc>, window_params = [{pipeline_mode = #tpu.pipeline_mode<synchronous>, transform_indices = @transform_0, window_bounds = array<i64: 16, 32>}, {pipeline_mode = #tpu.pipeline_mode<synchronous>, transform_indices = @transform_1, window_bounds = array<i64: 1, 32>}, {pipeline_mode = #tpu.pipeline_mode<synchronous>, transform_indices = @transform_2, window_bounds = array<i64: 16, 32>}]} {
    %c0 = arith.constant 0 : index
    %c0_0 = arith.constant 0 : index
    %0 = vector.load %arg1[%c0, %c0_0] : memref<16x32xf32, #tpu.memory_space<vmem>>, vector<16x32xf32>
    %c0_1 = arith.constant 0 : index
    %c0_2 = arith.constant 0 : index
    %1 = vector.load %arg2[%c0_1, %c0_2] : memref<1x32xf32, #tpu.memory_space<vmem>>, vector<1x32xf32>
    %2 = arith.mulf %0, %0 : vector<16x32xf32>
    %cst = arith.constant dense<0.000000e+00> : vector<16xf32>
    %3 = vector.multi_reduction <add>, %2, %cst [1] : vector<16x32xf32> to vector<16xf32>
    %4 = vector.shape_cast %3 : vector<16xf32> to vector<16x1xf32>
    %cst_3 = arith.constant 3.200000e+01 : f32
    %5 = vector.broadcast %cst_3 : f32 to vector<16x1xf32>
    %6 = arith.divf %4, %5 : vector<16x1xf32>
    %cst_4 = arith.constant 9.99999997E-7 : f32
    %7 = vector.broadcast %cst_4 : f32 to vector<16x1xf32>
    %8 = arith.addf %6, %7 : vector<16x1xf32>
    %9 = math.rsqrt %8 : vector<16x1xf32>
    %10 = vector.broadcast %9 : vector<16x1xf32> to vector<16x32xf32>
    %11 = arith.mulf %0, %10 : vector<16x32xf32>
    %12 = vector.broadcast %1 : vector<1x32xf32> to vector<16x32xf32>
    %13 = arith.mulf %11, %12 : vector<16x32xf32>
    %c0_5 = arith.constant 0 : index
    %c0_6 = arith.constant 0 : index
    %14 = vector.load %arg3[%c0_5, %c0_6] : memref<16x32xf32, #tpu.memory_space<vmem>>, vector<16x32xf32>
    tpu.vector_store %arg3[%c0_5, %c0_6], %13 {strides = array<i32>} : memref<16x32xf32, #tpu.memory_space<vmem>>, vector<16x32xf32>,
    return
  }
  func.func @transform_0(%arg0: i32) -> (i32, i32) {
    %c0_i32 = arith.constant 0 : i32
    %c0_i32_0 = arith.constant 0 : i32
    %c0_i32_1 = arith.constant 0 : i32
    return %c0_i32, %c0_i32_0 : i32, i32
  }
  func.func @transform_1(%arg0: i32) -> (i32, i32) {
    %c0_i32 = arith.constant 0 : i32
    %c0_i32_0 = arith.constant 0 : i32
    %c0_i32_1 = arith.constant 0 : i32
    return %c0_i32, %c0_i32_0 : i32, i32
  }
  func.func @transform_2(%arg0: i32) -> (i32, i32) {
    %c0_i32 = arith.constant 0 : i32
    %c0_i32_0 = arith.constant 0 : i32
    %c0_i32_1 = arith.constant 0 : i32
    return %c0_i32, %c0_i32_0 : i32, i32
  }
}

module attributes {stable_mosaic.version = 11 : i64} {
  func.func @_matmul_kernel(%arg0: i32, %arg1: memref<16x192xf32, #tpu.memory_space<vmem>>, %arg2: memref<192x32xbf16, #tpu.memory_space<vmem>>, %arg3: memref<16x32xf32, #tpu.memory_space<vmem>>) attributes {dimension_semantics = [#tpu.dimension_semantics<arbitrary>], iteration_bounds = array<i64: 1>, scalar_prefetch = 0 : i64, scratch_operands = 0 : i64, tpu.core_type = #tpu.core_type<tc>, window_params = [{pipeline_mode = #tpu.pipeline_mode<synchronous>, transform_indices = @transform_0, window_bounds = array<i64: 16, 192>}, {pipeline_mode = #tpu.pipeline_mode<synchronous>, transform_indices = @transform_1, window_bounds = array<i64: 192, 32>}, {pipeline_mode = #tpu.pipeline_mode<synchronous>, transform_indices = @transform_2, window_bounds = array<i64: 16, 32>}]} {
    %c0 = arith.constant 0 : index
    %c0_0 = arith.constant 0 : index
    %0 = vector.load %arg1[%c0, %c0_0] : memref<16x192xf32, #tpu.memory_space<vmem>>, vector<16x192xf32>
    %1 = arith.truncf %0 : vector<16x192xf32> to vector<16x192xbf16>
    %c0_1 = arith.constant 0 : index
    %c0_2 = arith.constant 0 : index
    %2 = vector.load %arg2[%c0_1, %c0_2] : memref<192x32xbf16, #tpu.memory_space<vmem>>, vector<192x32xbf16>
    %cst = arith.constant dense<0.000000e+00> : vector<16x32xf32>
    %3 = tpu.matmul %1, %2, %cst {dimension_numbers = #tpu.dot_dimension_numbers<[1], [0], [0], [1], [0, 0, 1, 1], [], []>} : vector<16x192xbf16>, vector<192x32xbf16>, vector<16x32xf32> -> vector<16x32xf32>
    %c0_3 = arith.constant 0 : index
    %c0_4 = arith.constant 0 : index
    %4 = vector.load %arg3[%c0_3, %c0_4] : memref<16x32xf32, #tpu.memory_space<vmem>>, vector<16x32xf32>
    tpu.vector_store %arg3[%c0_3, %c0_4], %3 {strides = array<i32>} : memref<16x32xf32, #tpu.memory_space<vmem>>, vector<16x32xf32>,
    return
  }
  func.func @transform_0(%arg0: i32) -> (i32, i32) {
    %c0_i32 = arith.constant 0 : i32
    %c0_i32_0 = arith.constant 0 : i32
    %c0_i32_1 = arith.constant 0 : i32
    return %c0_i32, %c0_i32_0 : i32, i32
  }
  func.func @transform_1(%arg0: i32) -> (i32, i32) {
    %c0_i32 = arith.constant 0 : i32
    %c0_i32_0 = arith.constant 0 : i32
    %c0_i32_1 = arith.constant 0 : i32
    return %c0_i32, %c0_i32_0 : i32, i32
  }
  func.func @transform_2(%arg0: i32) -> (i32, i32) {
    %c0_i32 = arith.constant 0 : i32
    %c0_i32_0 = arith.constant 0 : i32
    %c0_i32_1 = arith.constant 0 : i32
    return %c0_i32, %c0_i32_0 : i32, i32
  }
}

module attributes {stable_mosaic.version = 11 : i64} {
  func.func @_encoder_layer_kernel(%arg0: i32, %arg1: memref<1x8x32xf32, #tpu.memory_space<vmem>>, %arg2: memref<1x1x8xf32, #tpu.memory_space<vmem>>, %arg3: memref<1x32xf32, #tpu.memory_space<vmem>>, %arg4: memref<32x96xbf16, #tpu.memory_space<vmem>>, %arg5: memref<32x32xbf16, #tpu.memory_space<vmem>>, %arg6: memref<1x32xf32, #tpu.memory_space<vmem>>, %arg7: memref<32x128xbf16, #tpu.memory_space<vmem>>, %arg8: memref<64x32xbf16, #tpu.memory_space<vmem>>, %arg9: memref<1x8x32xf32, #tpu.memory_space<vmem>>) attributes {dimension_semantics = [#tpu.dimension_semantics<parallel>], iteration_bounds = array<i64: 2>, scalar_prefetch = 0 : i64, scratch_operands = 0 : i64, tpu.core_type = #tpu.core_type<tc>, window_params = [{transform_indices = @transform_0, window_bounds = array<i64: 1, 8, 32>}, {transform_indices = @transform_1, window_bounds = array<i64: 1, 1, 8>}, {pipeline_mode = #tpu.pipeline_mode<synchronous>, transform_indices = @transform_2, window_bounds = array<i64: 1, 32>}, {pipeline_mode = #tpu.pipeline_mode<synchronous>, transform_indices = @transform_3, window_bounds = array<i64: 32, 96>}, {pipeline_mode = #tpu.pipeline_mode<synchronous>, transform_indices = @transform_4, window_bounds = array<i64: 32, 32>}, {pipeline_mode = #tpu.pipeline_mode<synchronous>, transform_indices = @transform_5, window_bounds = array<i64: 1, 32>}, {pipeline_mode = #tpu.pipeline_mode<synchronous>, transform_indices = @transform_6, window_bounds = array<i64: 32, 128>}, {pipeline_mode = #tpu.pipeline_mode<synchronous>, transform_indices = @transform_7, window_bounds = array<i64: 64, 32>}, {transform_indices = @transform_8, window_bounds = array<i64: 1, 8, 32>}]} {
    %c0 = arith.constant 0 : index
    %c0_0 = arith.constant 0 : index
    %c0_1 = arith.constant 0 : index
    %0 = vector.load %arg1[%c0, %c0_0, %c0_1] : memref<1x8x32xf32, #tpu.memory_space<vmem>>, vector<1x8x32xf32>
    %1 = vector.shape_cast %0 : vector<1x8x32xf32> to vector<8x32xf32>
    %c0_2 = arith.constant 0 : index
    %c0_3 = arith.constant 0 : index
    %c0_4 = arith.constant 0 : index
    %2 = vector.load %arg2[%c0_2, %c0_3, %c0_4] : memref<1x1x8xf32, #tpu.memory_space<vmem>>, vector<1x1x8xf32>
    %3 = vector.shape_cast %2 : vector<1x1x8xf32> to vector<1x8xf32>
    %cst = arith.constant 1.000000e+00 : f32
    %4 = vector.broadcast %cst : f32 to vector<1x8xf32>
    %5 = arith.subf %4, %3 : vector<1x8xf32>
    %cst_5 = arith.constant -1.000000e+09 : f32
    %6 = vector.broadcast %cst_5 : f32 to vector<1x8xf32>
    %7 = arith.mulf %5, %6 : vector<1x8xf32>
    %c0_6 = arith.constant 0 : index
    %c0_7 = arith.constant 0 : index
    %8 = vector.load %arg3[%c0_6, %c0_7] : memref<1x32xf32, #tpu.memory_space<vmem>>, vector<1x32xf32>
    %9 = arith.mulf %1, %1 : vector<8x32xf32>
    %cst_8 = arith.constant dense<0.000000e+00> : vector<8xf32>
    %10 = vector.multi_reduction <add>, %9, %cst_8 [1] : vector<8x32xf32> to vector<8xf32>
    %11 = vector.shape_cast %10 : vector<8xf32> to vector<8x1xf32>
    %cst_9 = arith.constant 3.200000e+01 : f32
    %12 = vector.broadcast %cst_9 : f32 to vector<8x1xf32>
    %13 = arith.divf %11, %12 : vector<8x1xf32>
    %cst_10 = arith.constant 9.99999997E-7 : f32
    %14 = vector.broadcast %cst_10 : f32 to vector<8x1xf32>
    %15 = arith.addf %13, %14 : vector<8x1xf32>
    %16 = math.rsqrt %15 : vector<8x1xf32>
    %17 = vector.broadcast %16 : vector<8x1xf32> to vector<8x32xf32>
    %18 = arith.mulf %1, %17 : vector<8x32xf32>
    %19 = vector.broadcast %8 : vector<1x32xf32> to vector<8x32xf32>
    %20 = arith.mulf %18, %19 : vector<8x32xf32>
    %21 = arith.truncf %20 : vector<8x32xf32> to vector<8x32xbf16>
    %c0_11 = arith.constant 0 : index
    %c0_12 = arith.constant 0 : index
    %22 = vector.load %arg4[%c0_11, %c0_12] : memref<32x96xbf16, #tpu.memory_space<vmem>>, vector<32x96xbf16>
    %cst_13 = arith.constant dense<0.000000e+00> : vector<8x96xf32>
    %23 = tpu.matmul %21, %22, %cst_13 {dimension_numbers = #tpu.dot_dimension_numbers<[1], [0], [0], [1], [0, 0, 1, 1], [], []>} : vector<8x32xbf16>, vector<32x96xbf16>, vector<8x96xf32> -> vector<8x96xf32>
    %24 = vector.extract_strided_slice %23 {offsets = [0, 0], sizes = [8, 32], strides = [1, 1]} : vector<8x96xf32> to vector<8x32xf32>
    %25 = vector.extract_strided_slice %23 {offsets = [0, 32], sizes = [8, 32], strides = [1, 1]} : vector<8x96xf32> to vector<8x32xf32>
    %26 = vector.extract_strided_slice %23 {offsets = [0, 64], sizes = [8, 32], strides = [1, 1]} : vector<8x96xf32> to vector<8x32xf32>
    %c0_14 = arith.constant 0 : index
    %c0_15 = arith.constant 0 : index
    %27 = vector.load %arg5[%c0_14, %c0_15] : memref<32x32xbf16, #tpu.memory_space<vmem>>, vector<32x32xbf16>
    %28 = vector.extract_strided_slice %24 {offsets = [0, 0], sizes = [8, 8], strides = [1, 1]} : vector<8x32xf32> to vector<8x8xf32>
    %29 = arith.truncf %28 : vector<8x8xf32> to vector<8x8xbf16>
    %30 = vector.extract_strided_slice %25 {offsets = [0, 0], sizes = [8, 8], strides = [1, 1]} : vector<8x32xf32> to vector<8x8xf32>
    %31 = arith.truncf %30 : vector<8x8xf32> to vector<8x8xbf16>
    %32 = vector.extract_strided_slice %26 {offsets = [0, 0], sizes = [8, 8], strides = [1, 1]} : vector<8x32xf32> to vector<8x8xf32>
    %33 = arith.truncf %32 : vector<8x8xf32> to vector<8x8xbf16>
    %cst_16 = arith.constant dense<0.000000e+00> : vector<8x8xf32>
    %34 = tpu.matmul %29, %31, %cst_16 {dimension_numbers = #tpu.dot_dimension_numbers<[1], [1], [0], [0], [0, 0, 1, 0], [], []>} : vector<8x8xbf16>, vector<8x8xbf16>, vector<8x8xf32> -> vector<8x8xf32>
    %35 = vector.broadcast %7 : vector<1x8xf32> to vector<8x8xf32>
    %36 = arith.addf %34, %35 : vector<8x8xf32>
    %cst_17 = arith.constant dense<0xFF800000> : vector<8xf32>
    %37 = vector.multi_reduction <maximumf>, %36, %cst_17 [1] : vector<8x8xf32> to vector<8xf32>
    %38 = vector.shape_cast %37 : vector<8xf32> to vector<8x1xf32>
    %39 = vector.broadcast %38 : vector<8x1xf32> to vector<8x8xf32>
    %40 = arith.subf %36, %39 : vector<8x8xf32>
    %41 = math.exp %40 : vector<8x8xf32>
    %cst_18 = arith.constant dense<0.000000e+00> : vector<8xf32>
    %42 = vector.multi_reduction <add>, %41, %cst_18 [1] : vector<8x8xf32> to vector<8xf32>
    %43 = vector.shape_cast %42 : vector<8xf32> to vector<8x1xf32>
    %44 = tpu.reciprocal %43 {approx = true} : vector<8x1xf32> -> vector<8x1xf32>
    %45 = vector.broadcast %44 : vector<8x1xf32> to vector<8x8xf32>
    %46 = arith.mulf %41, %45 : vector<8x8xf32>
    %47 = arith.truncf %46 : vector<8x8xf32> to vector<8x8xbf16>
    %cst_19 = arith.constant dense<0.000000e+00> : vector<8x8xf32>
    %48 = tpu.matmul %47, %33, %cst_19 {dimension_numbers = #tpu.dot_dimension_numbers<[1], [0], [0], [1], [0, 0, 1, 1], [], []>} : vector<8x8xbf16>, vector<8x8xbf16>, vector<8x8xf32> -> vector<8x8xf32>
    %49 = vector.extract_strided_slice %24 {offsets = [0, 8], sizes = [8, 8], strides = [1, 1]} : vector<8x32xf32> to vector<8x8xf32>
    %50 = arith.truncf %49 : vector<8x8xf32> to vector<8x8xbf16>
    %51 = vector.extract_strided_slice %25 {offsets = [0, 8], sizes = [8, 8], strides = [1, 1]} : vector<8x32xf32> to vector<8x8xf32>
    %52 = arith.truncf %51 : vector<8x8xf32> to vector<8x8xbf16>
    %53 = vector.extract_strided_slice %26 {offsets = [0, 8], sizes = [8, 8], strides = [1, 1]} : vector<8x32xf32> to vector<8x8xf32>
    %54 = arith.truncf %53 : vector<8x8xf32> to vector<8x8xbf16>
    %cst_20 = arith.constant dense<0.000000e+00> : vector<8x8xf32>
    %55 = tpu.matmul %50, %52, %cst_20 {dimension_numbers = #tpu.dot_dimension_numbers<[1], [1], [0], [0], [0, 0, 1, 0], [], []>} : vector<8x8xbf16>, vector<8x8xbf16>, vector<8x8xf32> -> vector<8x8xf32>
    %56 = vector.broadcast %7 : vector<1x8xf32> to vector<8x8xf32>
    %57 = arith.addf %55, %56 : vector<8x8xf32>
    %cst_21 = arith.constant dense<0xFF800000> : vector<8xf32>
    %58 = vector.multi_reduction <maximumf>, %57, %cst_21 [1] : vector<8x8xf32> to vector<8xf32>
    %59 = vector.shape_cast %58 : vector<8xf32> to vector<8x1xf32>
    %60 = vector.broadcast %59 : vector<8x1xf32> to vector<8x8xf32>
    %61 = arith.subf %57, %60 : vector<8x8xf32>
    %62 = math.exp %61 : vector<8x8xf32>
    %cst_22 = arith.constant dense<0.000000e+00> : vector<8xf32>
    %63 = vector.multi_reduction <add>, %62, %cst_22 [1] : vector<8x8xf32> to vector<8xf32>
    %64 = vector.shape_cast %63 : vector<8xf32> to vector<8x1xf32>
    %65 = tpu.reciprocal %64 {approx = true} : vector<8x1xf32> -> vector<8x1xf32>
    %66 = vector.broadcast %65 : vector<8x1xf32> to vector<8x8xf32>
    %67 = arith.mulf %62, %66 : vector<8x8xf32>
    %68 = arith.truncf %67 : vector<8x8xf32> to vector<8x8xbf16>
    %cst_23 = arith.constant dense<0.000000e+00> : vector<8x8xf32>
    %69 = tpu.matmul %68, %54, %cst_23 {dimension_numbers = #tpu.dot_dimension_numbers<[1], [0], [0], [1], [0, 0, 1, 1], [], []>} : vector<8x8xbf16>, vector<8x8xbf16>, vector<8x8xf32> -> vector<8x8xf32>
    %70 = vector.extract_strided_slice %24 {offsets = [0, 16], sizes = [8, 8], strides = [1, 1]} : vector<8x32xf32> to vector<8x8xf32>
    %71 = arith.truncf %70 : vector<8x8xf32> to vector<8x8xbf16>
    %72 = vector.extract_strided_slice %25 {offsets = [0, 16], sizes = [8, 8], strides = [1, 1]} : vector<8x32xf32> to vector<8x8xf32>
    %73 = arith.truncf %72 : vector<8x8xf32> to vector<8x8xbf16>
    %74 = vector.extract_strided_slice %26 {offsets = [0, 16], sizes = [8, 8], strides = [1, 1]} : vector<8x32xf32> to vector<8x8xf32>
    %75 = arith.truncf %74 : vector<8x8xf32> to vector<8x8xbf16>
    %cst_24 = arith.constant dense<0.000000e+00> : vector<8x8xf32>
    %76 = tpu.matmul %71, %73, %cst_24 {dimension_numbers = #tpu.dot_dimension_numbers<[1], [1], [0], [0], [0, 0, 1, 0], [], []>} : vector<8x8xbf16>, vector<8x8xbf16>, vector<8x8xf32> -> vector<8x8xf32>
    %77 = vector.broadcast %7 : vector<1x8xf32> to vector<8x8xf32>
    %78 = arith.addf %76, %77 : vector<8x8xf32>
    %cst_25 = arith.constant dense<0xFF800000> : vector<8xf32>
    %79 = vector.multi_reduction <maximumf>, %78, %cst_25 [1] : vector<8x8xf32> to vector<8xf32>
    %80 = vector.shape_cast %79 : vector<8xf32> to vector<8x1xf32>
    %81 = vector.broadcast %80 : vector<8x1xf32> to vector<8x8xf32>
    %82 = arith.subf %78, %81 : vector<8x8xf32>
    %83 = math.exp %82 : vector<8x8xf32>
    %cst_26 = arith.constant dense<0.000000e+00> : vector<8xf32>
    %84 = vector.multi_reduction <add>, %83, %cst_26 [1] : vector<8x8xf32> to vector<8xf32>
    %85 = vector.shape_cast %84 : vector<8xf32> to vector<8x1xf32>
    %86 = tpu.reciprocal %85 {approx = true} : vector<8x1xf32> -> vector<8x1xf32>
    %87 = vector.broadcast %86 : vector<8x1xf32> to vector<8x8xf32>
    %88 = arith.mulf %83, %87 : vector<8x8xf32>
    %89 = arith.truncf %88 : vector<8x8xf32> to vector<8x8xbf16>
    %cst_27 = arith.constant dense<0.000000e+00> : vector<8x8xf32>
    %90 = tpu.matmul %89, %75, %cst_27 {dimension_numbers = #tpu.dot_dimension_numbers<[1], [0], [0], [1], [0, 0, 1, 1], [], []>} : vector<8x8xbf16>, vector<8x8xbf16>, vector<8x8xf32> -> vector<8x8xf32>
    %91 = vector.extract_strided_slice %24 {offsets = [0, 24], sizes = [8, 8], strides = [1, 1]} : vector<8x32xf32> to vector<8x8xf32>
    %92 = arith.truncf %91 : vector<8x8xf32> to vector<8x8xbf16>
    %93 = vector.extract_strided_slice %25 {offsets = [0, 24], sizes = [8, 8], strides = [1, 1]} : vector<8x32xf32> to vector<8x8xf32>
    %94 = arith.truncf %93 : vector<8x8xf32> to vector<8x8xbf16>
    %95 = vector.extract_strided_slice %26 {offsets = [0, 24], sizes = [8, 8], strides = [1, 1]} : vector<8x32xf32> to vector<8x8xf32>
    %96 = arith.truncf %95 : vector<8x8xf32> to vector<8x8xbf16>
    %cst_28 = arith.constant dense<0.000000e+00> : vector<8x8xf32>
    %97 = tpu.matmul %92, %94, %cst_28 {dimension_numbers = #tpu.dot_dimension_numbers<[1], [1], [0], [0], [0, 0, 1, 0], [], []>} : vector<8x8xbf16>, vector<8x8xbf16>, vector<8x8xf32> -> vector<8x8xf32>
    %98 = vector.broadcast %7 : vector<1x8xf32> to vector<8x8xf32>
    %99 = arith.addf %97, %98 : vector<8x8xf32>
    %cst_29 = arith.constant dense<0xFF800000> : vector<8xf32>
    %100 = vector.multi_reduction <maximumf>, %99, %cst_29 [1] : vector<8x8xf32> to vector<8xf32>
    %101 = vector.shape_cast %100 : vector<8xf32> to vector<8x1xf32>
    %102 = vector.broadcast %101 : vector<8x1xf32> to vector<8x8xf32>
    %103 = arith.subf %99, %102 : vector<8x8xf32>
    %104 = math.exp %103 : vector<8x8xf32>
    %cst_30 = arith.constant dense<0.000000e+00> : vector<8xf32>
    %105 = vector.multi_reduction <add>, %104, %cst_30 [1] : vector<8x8xf32> to vector<8xf32>
    %106 = vector.shape_cast %105 : vector<8xf32> to vector<8x1xf32>
    %107 = tpu.reciprocal %106 {approx = true} : vector<8x1xf32> -> vector<8x1xf32>
    %108 = vector.broadcast %107 : vector<8x1xf32> to vector<8x8xf32>
    %109 = arith.mulf %104, %108 : vector<8x8xf32>
    %110 = arith.truncf %109 : vector<8x8xf32> to vector<8x8xbf16>
    %cst_31 = arith.constant dense<0.000000e+00> : vector<8x8xf32>
    %111 = tpu.matmul %110, %96, %cst_31 {dimension_numbers = #tpu.dot_dimension_numbers<[1], [0], [0], [1], [0, 0, 1, 1], [], []>} : vector<8x8xbf16>, vector<8x8xbf16>, vector<8x8xf32> -> vector<8x8xf32>
    %112 = tpu.concatenate %48, %69, %90, %111 in 1 : vector<8x8xf32>, vector<8x8xf32>, vector<8x8xf32>, vector<8x8xf32> -> vector<8x32xf32>
    %113 = arith.truncf %112 : vector<8x32xf32> to vector<8x32xbf16>
    %cst_32 = arith.constant dense<0.000000e+00> : vector<8x32xf32>
    %114 = tpu.matmul %113, %27, %cst_32 {dimension_numbers = #tpu.dot_dimension_numbers<[1], [0], [0], [1], [0, 0, 1, 1], [], []>} : vector<8x32xbf16>, vector<32x32xbf16>, vector<8x32xf32> -> vector<8x32xf32>
    %115 = arith.addf %1, %114 : vector<8x32xf32>
    %c0_33 = arith.constant 0 : index
    %c0_34 = arith.constant 0 : index
    %116 = vector.load %arg6[%c0_33, %c0_34] : memref<1x32xf32, #tpu.memory_space<vmem>>, vector<1x32xf32>
    %117 = arith.mulf %115, %115 : vector<8x32xf32>
    %cst_35 = arith.constant dense<0.000000e+00> : vector<8xf32>
    %118 = vector.multi_reduction <add>, %117, %cst_35 [1] : vector<8x32xf32> to vector<8xf32>
    %119 = vector.shape_cast %118 : vector<8xf32> to vector<8x1xf32>
    %cst_36 = arith.constant 3.200000e+01 : f32
    %120 = vector.broadcast %cst_36 : f32 to vector<8x1xf32>
    %121 = arith.divf %119, %120 : vector<8x1xf32>
    %cst_37 = arith.constant 9.99999997E-7 : f32
    %122 = vector.broadcast %cst_37 : f32 to vector<8x1xf32>
    %123 = arith.addf %121, %122 : vector<8x1xf32>
    %124 = math.rsqrt %123 : vector<8x1xf32>
    %125 = vector.broadcast %124 : vector<8x1xf32> to vector<8x32xf32>
    %126 = arith.mulf %115, %125 : vector<8x32xf32>
    %127 = vector.broadcast %116 : vector<1x32xf32> to vector<8x32xf32>
    %128 = arith.mulf %126, %127 : vector<8x32xf32>
    %c0_38 = arith.constant 0 : index
    %c0_39 = arith.constant 0 : index
    %129 = vector.load %arg7[%c0_38, %c0_39] : memref<32x128xbf16, #tpu.memory_space<vmem>>, vector<32x128xbf16>
    %c0_40 = arith.constant 0 : index
    %c0_41 = arith.constant 0 : index
    %130 = vector.load %arg8[%c0_40, %c0_41] : memref<64x32xbf16, #tpu.memory_space<vmem>>, vector<64x32xbf16>
    %131 = arith.truncf %128 : vector<8x32xf32> to vector<8x32xbf16>
    %cst_42 = arith.constant dense<0.000000e+00> : vector<8x128xf32>
    %132 = tpu.matmul %131, %129, %cst_42 {dimension_numbers = #tpu.dot_dimension_numbers<[1], [0], [0], [1], [0, 0, 1, 1], [], []>} : vector<8x32xbf16>, vector<32x128xbf16>, vector<8x128xf32> -> vector<8x128xf32>
    %133 = vector.extract_strided_slice %132 {offsets = [0, 0], sizes = [8, 64], strides = [1, 1]} : vector<8x128xf32> to vector<8x64xf32>
    %134 = arith.mulf %133, %133 : vector<8x64xf32>
    %135 = arith.mulf %133, %134 : vector<8x64xf32>
    %cst_43 = arith.constant 4.471500e-02 : f32
    %136 = vector.broadcast %cst_43 : f32 to vector<8x64xf32>
    %137 = arith.mulf %136, %135 : vector<8x64xf32>
    %138 = arith.addf %133, %137 : vector<8x64xf32>
    %cst_44 = arith.constant 0.797884583 : f32
    %139 = vector.broadcast %cst_44 : f32 to vector<8x64xf32>
    %140 = arith.mulf %139, %138 : vector<8x64xf32>
    %141 = math.tanh %140 : vector<8x64xf32>
    %cst_45 = arith.constant 1.000000e+00 : f32
    %142 = vector.broadcast %cst_45 : f32 to vector<8x64xf32>
    %143 = arith.addf %142, %141 : vector<8x64xf32>
    %cst_46 = arith.constant 5.000000e-01 : f32
    %144 = vector.broadcast %cst_46 : f32 to vector<8x64xf32>
    %145 = arith.mulf %144, %143 : vector<8x64xf32>
    %146 = arith.mulf %133, %145 : vector<8x64xf32>
    %147 = vector.extract_strided_slice %132 {offsets = [0, 64], sizes = [8, 64], strides = [1, 1]} : vector<8x128xf32> to vector<8x64xf32>
    %148 = arith.mulf %146, %147 : vector<8x64xf32>
    %149 = arith.truncf %148 : vector<8x64xf32> to vector<8x64xbf16>
    %cst_47 = arith.constant dense<0.000000e+00> : vector<8x32xf32>
    %150 = tpu.matmul %149, %130, %cst_47 {dimension_numbers = #tpu.dot_dimension_numbers<[1], [0], [0], [1], [0, 0, 1, 1], [], []>} : vector<8x64xbf16>, vector<64x32xbf16>, vector<8x32xf32> -> vector<8x32xf32>
    %151 = arith.addf %115, %150 : vector<8x32xf32>
    %c0_48 = arith.constant 0 : index
    %c0_49 = arith.constant 0 : index
    %c0_50 = arith.constant 0 : index
    %152 = vector.load %arg9[%c0_48, %c0_49, %c0_50] : memref<1x8x32xf32, #tpu.memory_space<vmem>>, vector<1x8x32xf32>
    %153 = vector.shape_cast %152 : vector<1x8x32xf32> to vector<8x32xf32>
    %154 = vector.shape_cast %151 : vector<8x32xf32> to vector<1x8x32xf32>
    tpu.vector_store %arg9[%c0_48, %c0_49, %c0_50], %154 {strides = array<i32>} : memref<1x8x32xf32, #tpu.memory_space<vmem>>, vector<1x8x32xf32>,
    return
  }
  func.func @transform_0(%arg0: i32) -> (i32, i32, i32) {
    %c0_i32 = arith.constant 0 : i32
    %c0_i32_0 = arith.constant 0 : i32
    %c0_i32_1 = arith.constant 0 : i32
    return %arg0, %c0_i32, %c0_i32_0 : i32, i32, i32
  }
  func.func @transform_1(%arg0: i32) -> (i32, i32, i32) {
    %c0_i32 = arith.constant 0 : i32
    %c0_i32_0 = arith.constant 0 : i32
    %c0_i32_1 = arith.constant 0 : i32
    return %arg0, %c0_i32, %c0_i32_0 : i32, i32, i32
  }
  func.func @transform_2(%arg0: i32) -> (i32, i32) {
    %c0_i32 = arith.constant 0 : i32
    %c0_i32_0 = arith.constant 0 : i32
    %c0_i32_1 = arith.constant 0 : i32
    return %c0_i32, %c0_i32_0 : i32, i32
  }
  func.func @transform_3(%arg0: i32) -> (i32, i32) {
    %c0_i32 = arith.constant 0 : i32
    %c0_i32_0 = arith.constant 0 : i32
    %c0_i32_1 = arith.constant 0 : i32
    return %c0_i32, %c0_i32_0 : i32, i32
  }
  func.func @transform_4(%arg0: i32) -> (i32, i32) {
    %c0_i32 = arith.constant 0 : i32
    %c0_i32_0 = arith.constant 0 : i32
    %c0_i32_1 = arith.constant 0 : i32
    return %c0_i32, %c0_i32_0 : i32, i32
  }
  func.func @transform_5(%arg0: i32) -> (i32, i32) {
    %c0_i32 = arith.constant 0 : i32
    %c0_i32_0 = arith.constant 0 : i32
    %c0_i32_1 = arith.constant 0 : i32
    return %c0_i32, %c0_i32_0 : i32, i32
  }
  func.func @transform_6(%arg0: i32) -> (i32, i32) {
    %c0_i32 = arith.constant 0 : i32
    %c0_i32_0 = arith.constant 0 : i32
    %c0_i32_1 = arith.constant 0 : i32
    return %c0_i32, %c0_i32_0 : i32, i32
  }
  func.func @transform_7(%arg0: i32) -> (i32, i32) {
    %c0_i32 = arith.constant 0 : i32
    %c0_i32_0 = arith.constant 0 : i32
    %c0_i32_1 = arith.constant 0 : i32
    return %c0_i32, %c0_i32_0 : i32, i32
  }
  func.func @transform_8(%arg0: i32) -> (i32, i32, i32) {
    %c0_i32 = arith.constant 0 : i32
    %c0_i32_0 = arith.constant 0 : i32
    %c0_i32_1 = arith.constant 0 : i32
    return %arg0, %c0_i32, %c0_i32_0 : i32, i32, i32
  }
}

module attributes {stable_mosaic.version = 11 : i64} {
  func.func @_final_head_kernel(%arg0: i32, %arg1: memref<10x32xf32, #tpu.memory_space<vmem>>, %arg2: memref<1x32xf32, #tpu.memory_space<vmem>>, %arg3: memref<32x64xbf16, #tpu.memory_space<vmem>>, %arg4: memref<10x64xf32, #tpu.memory_space<vmem>>) attributes {dimension_semantics = [#tpu.dimension_semantics<arbitrary>], iteration_bounds = array<i64: 1>, scalar_prefetch = 0 : i64, scratch_operands = 0 : i64, tpu.core_type = #tpu.core_type<tc>, window_params = [{pipeline_mode = #tpu.pipeline_mode<synchronous>, transform_indices = @transform_0, window_bounds = array<i64: 10, 32>}, {pipeline_mode = #tpu.pipeline_mode<synchronous>, transform_indices = @transform_1, window_bounds = array<i64: 1, 32>}, {pipeline_mode = #tpu.pipeline_mode<synchronous>, transform_indices = @transform_2, window_bounds = array<i64: 32, 64>}, {pipeline_mode = #tpu.pipeline_mode<synchronous>, transform_indices = @transform_3, window_bounds = array<i64: 10, 64>}]} {
    %c0 = arith.constant 0 : index
    %c0_0 = arith.constant 0 : index
    %0 = vector.load %arg1[%c0, %c0_0] : memref<10x32xf32, #tpu.memory_space<vmem>>, vector<10x32xf32>
    %c0_1 = arith.constant 0 : index
    %c0_2 = arith.constant 0 : index
    %1 = vector.load %arg2[%c0_1, %c0_2] : memref<1x32xf32, #tpu.memory_space<vmem>>, vector<1x32xf32>
    %2 = arith.mulf %0, %0 : vector<10x32xf32>
    %cst = arith.constant dense<0.000000e+00> : vector<10xf32>
    %3 = vector.multi_reduction <add>, %2, %cst [1] : vector<10x32xf32> to vector<10xf32>
    %4 = vector.shape_cast %3 : vector<10xf32> to vector<10x1xf32>
    %cst_3 = arith.constant 3.200000e+01 : f32
    %5 = vector.broadcast %cst_3 : f32 to vector<10x1xf32>
    %6 = arith.divf %4, %5 : vector<10x1xf32>
    %cst_4 = arith.constant 9.99999997E-7 : f32
    %7 = vector.broadcast %cst_4 : f32 to vector<10x1xf32>
    %8 = arith.addf %6, %7 : vector<10x1xf32>
    %9 = math.rsqrt %8 : vector<10x1xf32>
    %10 = vector.broadcast %9 : vector<10x1xf32> to vector<10x32xf32>
    %11 = arith.mulf %0, %10 : vector<10x32xf32>
    %12 = vector.broadcast %1 : vector<1x32xf32> to vector<10x32xf32>
    %13 = arith.mulf %11, %12 : vector<10x32xf32>
    %14 = arith.truncf %13 : vector<10x32xf32> to vector<10x32xbf16>
    %c0_5 = arith.constant 0 : index
    %c0_6 = arith.constant 0 : index
    %15 = vector.load %arg3[%c0_5, %c0_6] : memref<32x64xbf16, #tpu.memory_space<vmem>>, vector<32x64xbf16>
    %cst_7 = arith.constant dense<0.000000e+00> : vector<10x64xf32>
    %16 = tpu.matmul %14, %15, %cst_7 {dimension_numbers = #tpu.dot_dimension_numbers<[1], [0], [0], [1], [0, 0, 1, 1], [], []>} : vector<10x32xbf16>, vector<32x64xbf16>, vector<10x64xf32> -> vector<10x64xf32>
    %c0_8 = arith.constant 0 : index
    %c0_9 = arith.constant 0 : index
    %17 = vector.load %arg4[%c0_8, %c0_9] : memref<10x64xf32, #tpu.memory_space<vmem>>, vector<10x64xf32>
    tpu.vector_store %arg4[%c0_8, %c0_9], %16 {strides = array<i32>} : memref<10x64xf32, #tpu.memory_space<vmem>>, vector<10x64xf32>,
    return
  }
  func.func @transform_0(%arg0: i32) -> (i32, i32) {
    %c0_i32 = arith.constant 0 : i32
    %c0_i32_0 = arith.constant 0 : i32
    %c0_i32_1 = arith.constant 0 : i32
    return %c0_i32, %c0_i32_0 : i32, i32
  }
  func.func @transform_1(%arg0: i32) -> (i32, i32) {
    %c0_i32 = arith.constant 0 : i32
    %c0_i32_0 = arith.constant 0 : i32
    %c0_i32_1 = arith.constant 0 : i32
    return %c0_i32, %c0_i32_0 : i32, i32
  }
  func.func @transform_2(%arg0: i32) -> (i32, i32) {
    %c0_i32 = arith.constant 0 : i32
    %c0_i32_0 = arith.constant 0 : i32
    %c0_i32_1 = arith.constant 0 : i32
    return %c0_i32, %c0_i32_0 : i32, i32
  }
  func.func @transform_3(%arg0: i32) -> (i32, i32) {
    %c0_i32 = arith.constant 0 : i32
    %c0_i32_0 = arith.constant 0 : i32
    %c0_i32_1 = arith.constant 0 : i32
    return %c0_i32, %c0_i32_0 : i32, i32
  }
}

module attributes {stable_mosaic.version = 11 : i64} {
  func.func @_decoder_layer_kernel(%arg0: i32, %arg1: memref<1x5x32xf32, #tpu.memory_space<vmem>>, %arg2: memref<1x8x32xf32, #tpu.memory_space<vmem>>, %arg3: memref<1x1x8xf32, #tpu.memory_space<vmem>>, %arg4: memref<4x5x5xf32, #tpu.memory_space<vmem>>, %arg5: memref<1x32xf32, #tpu.memory_space<vmem>>, %arg6: memref<32x96xbf16, #tpu.memory_space<vmem>>, %arg7: memref<32x32xbf16, #tpu.memory_space<vmem>>, %arg8: memref<1x32xf32, #tpu.memory_space<vmem>>, %arg9: memref<32x32xbf16, #tpu.memory_space<vmem>>, %arg10: memref<32x64xbf16, #tpu.memory_space<vmem>>, %arg11: memref<32x32xbf16, #tpu.memory_space<vmem>>, %arg12: memref<1x32xf32, #tpu.memory_space<vmem>>, %arg13: memref<32x128xbf16, #tpu.memory_space<vmem>>, %arg14: memref<64x32xbf16, #tpu.memory_space<vmem>>, %arg15: memref<1x5x32xf32, #tpu.memory_space<vmem>>) attributes {dimension_semantics = [#tpu.dimension_semantics<parallel>], iteration_bounds = array<i64: 2>, scalar_prefetch = 0 : i64, scratch_operands = 0 : i64, tpu.core_type = #tpu.core_type<tc>, window_params = [{transform_indices = @transform_0, window_bounds = array<i64: 1, 5, 32>}, {transform_indices = @transform_1, window_bounds = array<i64: 1, 8, 32>}, {transform_indices = @transform_2, window_bounds = array<i64: 1, 1, 8>}, {pipeline_mode = #tpu.pipeline_mode<synchronous>, transform_indices = @transform_3, window_bounds = array<i64: 4, 5, 5>}, {pipeline_mode = #tpu.pipeline_mode<synchronous>, transform_indices = @transform_4, window_bounds = array<i64: 1, 32>}, {pipeline_mode = #tpu.pipeline_mode<synchronous>, transform_indices = @transform_5, window_bounds = array<i64: 32, 96>}, {pipeline_mode = #tpu.pipeline_mode<synchronous>, transform_indices = @transform_6, window_bounds = array<i64: 32, 32>}, {pipeline_mode = #tpu.pipeline_mode<synchronous>, transform_indices = @transform_7, window_bounds = array<i64: 1, 32>}, {pipeline_mode = #tpu.pipeline_mode<synchronous>, transform_indices = @transform_8, window_bounds = array<i64: 32, 32>}, {pipeline_mode = #tpu.pipeline_mode<synchronous>, transform_indices = @transform_9, window_bounds = array<i64: 32, 64>}, {pipeline_mode = #tpu.pipeline_mode<synchronous>, transform_indices = @transform_10, window_bounds = array<i64: 32, 32>}, {pipeline_mode = #tpu.pipeline_mode<synchronous>, transform_indices = @transform_11, window_bounds = array<i64: 1, 32>}, {pipeline_mode = #tpu.pipeline_mode<synchronous>, transform_indices = @transform_12, window_bounds = array<i64: 32, 128>}, {pipeline_mode = #tpu.pipeline_mode<synchronous>, transform_indices = @transform_13, window_bounds = array<i64: 64, 32>}, {transform_indices = @transform_14, window_bounds = array<i64: 1, 5, 32>}]} {
    %c0 = arith.constant 0 : index
    %c0_0 = arith.constant 0 : index
    %c0_1 = arith.constant 0 : index
    %0 = vector.load %arg1[%c0, %c0_0, %c0_1] : memref<1x5x32xf32, #tpu.memory_space<vmem>>, vector<1x5x32xf32>
    %1 = vector.shape_cast %0 : vector<1x5x32xf32> to vector<5x32xf32>
    %c0_2 = arith.constant 0 : index
    %c0_3 = arith.constant 0 : index
    %c0_4 = arith.constant 0 : index
    %2 = vector.load %arg2[%c0_2, %c0_3, %c0_4] : memref<1x8x32xf32, #tpu.memory_space<vmem>>, vector<1x8x32xf32>
    %3 = vector.shape_cast %2 : vector<1x8x32xf32> to vector<8x32xf32>
    %c0_5 = arith.constant 0 : index
    %c0_6 = arith.constant 0 : index
    %c0_7 = arith.constant 0 : index
    %4 = vector.load %arg3[%c0_5, %c0_6, %c0_7] : memref<1x1x8xf32, #tpu.memory_space<vmem>>, vector<1x1x8xf32>
    %5 = vector.shape_cast %4 : vector<1x1x8xf32> to vector<1x8xf32>
    %cst = arith.constant 1.000000e+00 : f32
    %6 = vector.broadcast %cst : f32 to vector<1x8xf32>
    %7 = arith.subf %6, %5 : vector<1x8xf32>
    %cst_8 = arith.constant -1.000000e+09 : f32
    %8 = vector.broadcast %cst_8 : f32 to vector<1x8xf32>
    %9 = arith.mulf %7, %8 : vector<1x8xf32>
    %c0_9 = arith.constant 0 : index
    %c0_10 = arith.constant 0 : index
    %10 = vector.load %arg5[%c0_9, %c0_10] : memref<1x32xf32, #tpu.memory_space<vmem>>, vector<1x32xf32>
    %11 = arith.mulf %1, %1 : vector<5x32xf32>
    %cst_11 = arith.constant dense<0.000000e+00> : vector<5xf32>
    %12 = vector.multi_reduction <add>, %11, %cst_11 [1] : vector<5x32xf32> to vector<5xf32>
    %13 = vector.shape_cast %12 : vector<5xf32> to vector<5x1xf32>
    %cst_12 = arith.constant 3.200000e+01 : f32
    %14 = vector.broadcast %cst_12 : f32 to vector<5x1xf32>
    %15 = arith.divf %13, %14 : vector<5x1xf32>
    %cst_13 = arith.constant 9.99999997E-7 : f32
    %16 = vector.broadcast %cst_13 : f32 to vector<5x1xf32>
    %17 = arith.addf %15, %16 : vector<5x1xf32>
    %18 = math.rsqrt %17 : vector<5x1xf32>
    %19 = vector.broadcast %18 : vector<5x1xf32> to vector<5x32xf32>
    %20 = arith.mulf %1, %19 : vector<5x32xf32>
    %21 = vector.broadcast %10 : vector<1x32xf32> to vector<5x32xf32>
    %22 = arith.mulf %20, %21 : vector<5x32xf32>
    %23 = arith.truncf %22 : vector<5x32xf32> to vector<5x32xbf16>
    %c0_14 = arith.constant 0 : index
    %c0_15 = arith.constant 0 : index
    %24 = vector.load %arg6[%c0_14, %c0_15] : memref<32x96xbf16, #tpu.memory_space<vmem>>, vector<32x96xbf16>
    %cst_16 = arith.constant dense<0.000000e+00> : vector<5x96xf32>
    %25 = tpu.matmul %23, %24, %cst_16 {dimension_numbers = #tpu.dot_dimension_numbers<[1], [0], [0], [1], [0, 0, 1, 1], [], []>} : vector<5x32xbf16>, vector<32x96xbf16>, vector<5x96xf32> -> vector<5x96xf32>
    %26 = vector.extract_strided_slice %25 {offsets = [0, 0], sizes = [5, 32], strides = [1, 1]} : vector<5x96xf32> to vector<5x32xf32>
    %27 = vector.extract_strided_slice %25 {offsets = [0, 32], sizes = [5, 32], strides = [1, 1]} : vector<5x96xf32> to vector<5x32xf32>
    %28 = vector.extract_strided_slice %25 {offsets = [0, 64], sizes = [5, 32], strides = [1, 1]} : vector<5x96xf32> to vector<5x32xf32>
    %c0_17 = arith.constant 0 : index
    %c0_18 = arith.constant 0 : index
    %29 = vector.load %arg7[%c0_17, %c0_18] : memref<32x32xbf16, #tpu.memory_space<vmem>>, vector<32x32xbf16>
    %30 = vector.extract_strided_slice %26 {offsets = [0, 0], sizes = [5, 8], strides = [1, 1]} : vector<5x32xf32> to vector<5x8xf32>
    %31 = arith.truncf %30 : vector<5x8xf32> to vector<5x8xbf16>
    %32 = vector.extract_strided_slice %27 {offsets = [0, 0], sizes = [5, 8], strides = [1, 1]} : vector<5x32xf32> to vector<5x8xf32>
    %33 = arith.truncf %32 : vector<5x8xf32> to vector<5x8xbf16>
    %34 = vector.extract_strided_slice %28 {offsets = [0, 0], sizes = [5, 8], strides = [1, 1]} : vector<5x32xf32> to vector<5x8xf32>
    %35 = arith.truncf %34 : vector<5x8xf32> to vector<5x8xbf16>
    %cst_19 = arith.constant dense<0.000000e+00> : vector<5x5xf32>
    %36 = tpu.matmul %31, %33, %cst_19 {dimension_numbers = #tpu.dot_dimension_numbers<[1], [1], [0], [0], [0, 0, 1, 0], [], []>} : vector<5x8xbf16>, vector<5x8xbf16>, vector<5x5xf32> -> vector<5x5xf32>
    %c0_20 = arith.constant 0 : index
    %c0_21 = arith.constant 0 : index
    %c0_22 = arith.constant 0 : index
    %37 = vector.load %arg4[%c0_20, %c0_21, %c0_22] : memref<4x5x5xf32, #tpu.memory_space<vmem>>, vector<1x5x5xf32>
    %38 = vector.shape_cast %37 : vector<1x5x5xf32> to vector<5x5xf32>
    %39 = arith.addf %36, %38 : vector<5x5xf32>
    %cst_23 = arith.constant dense<0xFF800000> : vector<5xf32>
    %40 = vector.multi_reduction <maximumf>, %39, %cst_23 [1] : vector<5x5xf32> to vector<5xf32>
    %41 = vector.shape_cast %40 : vector<5xf32> to vector<5x1xf32>
    %42 = vector.broadcast %41 : vector<5x1xf32> to vector<5x5xf32>
    %43 = arith.subf %39, %42 : vector<5x5xf32>
    %44 = math.exp %43 : vector<5x5xf32>
    %cst_24 = arith.constant dense<0.000000e+00> : vector<5xf32>
    %45 = vector.multi_reduction <add>, %44, %cst_24 [1] : vector<5x5xf32> to vector<5xf32>
    %46 = vector.shape_cast %45 : vector<5xf32> to vector<5x1xf32>
    %47 = tpu.reciprocal %46 {approx = true} : vector<5x1xf32> -> vector<5x1xf32>
    %48 = vector.broadcast %47 : vector<5x1xf32> to vector<5x5xf32>
    %49 = arith.mulf %44, %48 : vector<5x5xf32>
    %50 = arith.truncf %49 : vector<5x5xf32> to vector<5x5xbf16>
    %cst_25 = arith.constant dense<0.000000e+00> : vector<5x8xf32>
    %51 = tpu.matmul %50, %35, %cst_25 {dimension_numbers = #tpu.dot_dimension_numbers<[1], [0], [0], [1], [0, 0, 1, 1], [], []>} : vector<5x5xbf16>, vector<5x8xbf16>, vector<5x8xf32> -> vector<5x8xf32>
    %52 = vector.extract_strided_slice %26 {offsets = [0, 8], sizes = [5, 8], strides = [1, 1]} : vector<5x32xf32> to vector<5x8xf32>
    %53 = arith.truncf %52 : vector<5x8xf32> to vector<5x8xbf16>
    %54 = vector.extract_strided_slice %27 {offsets = [0, 8], sizes = [5, 8], strides = [1, 1]} : vector<5x32xf32> to vector<5x8xf32>
    %55 = arith.truncf %54 : vector<5x8xf32> to vector<5x8xbf16>
    %56 = vector.extract_strided_slice %28 {offsets = [0, 8], sizes = [5, 8], strides = [1, 1]} : vector<5x32xf32> to vector<5x8xf32>
    %57 = arith.truncf %56 : vector<5x8xf32> to vector<5x8xbf16>
    %cst_26 = arith.constant dense<0.000000e+00> : vector<5x5xf32>
    %58 = tpu.matmul %53, %55, %cst_26 {dimension_numbers = #tpu.dot_dimension_numbers<[1], [1], [0], [0], [0, 0, 1, 0], [], []>} : vector<5x8xbf16>, vector<5x8xbf16>, vector<5x5xf32> -> vector<5x5xf32>
    %c1 = arith.constant 1 : index
    %c0_27 = arith.constant 0 : index
    %c0_28 = arith.constant 0 : index
    %59 = vector.load %arg4[%c1, %c0_27, %c0_28] : memref<4x5x5xf32, #tpu.memory_space<vmem>>, vector<1x5x5xf32>
    %60 = vector.shape_cast %59 : vector<1x5x5xf32> to vector<5x5xf32>
    %61 = arith.addf %58, %60 : vector<5x5xf32>
    %cst_29 = arith.constant dense<0xFF800000> : vector<5xf32>
    %62 = vector.multi_reduction <maximumf>, %61, %cst_29 [1] : vector<5x5xf32> to vector<5xf32>
    %63 = vector.shape_cast %62 : vector<5xf32> to vector<5x1xf32>
    %64 = vector.broadcast %63 : vector<5x1xf32> to vector<5x5xf32>
    %65 = arith.subf %61, %64 : vector<5x5xf32>
    %66 = math.exp %65 : vector<5x5xf32>
    %cst_30 = arith.constant dense<0.000000e+00> : vector<5xf32>
    %67 = vector.multi_reduction <add>, %66, %cst_30 [1] : vector<5x5xf32> to vector<5xf32>
    %68 = vector.shape_cast %67 : vector<5xf32> to vector<5x1xf32>
    %69 = tpu.reciprocal %68 {approx = true} : vector<5x1xf32> -> vector<5x1xf32>
    %70 = vector.broadcast %69 : vector<5x1xf32> to vector<5x5xf32>
    %71 = arith.mulf %66, %70 : vector<5x5xf32>
    %72 = arith.truncf %71 : vector<5x5xf32> to vector<5x5xbf16>
    %cst_31 = arith.constant dense<0.000000e+00> : vector<5x8xf32>
    %73 = tpu.matmul %72, %57, %cst_31 {dimension_numbers = #tpu.dot_dimension_numbers<[1], [0], [0], [1], [0, 0, 1, 1], [], []>} : vector<5x5xbf16>, vector<5x8xbf16>, vector<5x8xf32> -> vector<5x8xf32>
    %74 = vector.extract_strided_slice %26 {offsets = [0, 16], sizes = [5, 8], strides = [1, 1]} : vector<5x32xf32> to vector<5x8xf32>
    %75 = arith.truncf %74 : vector<5x8xf32> to vector<5x8xbf16>
    %76 = vector.extract_strided_slice %27 {offsets = [0, 16], sizes = [5, 8], strides = [1, 1]} : vector<5x32xf32> to vector<5x8xf32>
    %77 = arith.truncf %76 : vector<5x8xf32> to vector<5x8xbf16>
    %78 = vector.extract_strided_slice %28 {offsets = [0, 16], sizes = [5, 8], strides = [1, 1]} : vector<5x32xf32> to vector<5x8xf32>
    %79 = arith.truncf %78 : vector<5x8xf32> to vector<5x8xbf16>
    %cst_32 = arith.constant dense<0.000000e+00> : vector<5x5xf32>
    %80 = tpu.matmul %75, %77, %cst_32 {dimension_numbers = #tpu.dot_dimension_numbers<[1], [1], [0], [0], [0, 0, 1, 0], [], []>} : vector<5x8xbf16>, vector<5x8xbf16>, vector<5x5xf32> -> vector<5x5xf32>
    %c2 = arith.constant 2 : index
    %c0_33 = arith.constant 0 : index
    %c0_34 = arith.constant 0 : index
    %81 = vector.load %arg4[%c2, %c0_33, %c0_34] : memref<4x5x5xf32, #tpu.memory_space<vmem>>, vector<1x5x5xf32>
    %82 = vector.shape_cast %81 : vector<1x5x5xf32> to vector<5x5xf32>
    %83 = arith.addf %80, %82 : vector<5x5xf32>
    %cst_35 = arith.constant dense<0xFF800000> : vector<5xf32>
    %84 = vector.multi_reduction <maximumf>, %83, %cst_35 [1] : vector<5x5xf32> to vector<5xf32>
    %85 = vector.shape_cast %84 : vector<5xf32> to vector<5x1xf32>
    %86 = vector.broadcast %85 : vector<5x1xf32> to vector<5x5xf32>
    %87 = arith.subf %83, %86 : vector<5x5xf32>
    %88 = math.exp %87 : vector<5x5xf32>
    %cst_36 = arith.constant dense<0.000000e+00> : vector<5xf32>
    %89 = vector.multi_reduction <add>, %88, %cst_36 [1] : vector<5x5xf32> to vector<5xf32>
    %90 = vector.shape_cast %89 : vector<5xf32> to vector<5x1xf32>
    %91 = tpu.reciprocal %90 {approx = true} : vector<5x1xf32> -> vector<5x1xf32>
    %92 = vector.broadcast %91 : vector<5x1xf32> to vector<5x5xf32>
    %93 = arith.mulf %88, %92 : vector<5x5xf32>
    %94 = arith.truncf %93 : vector<5x5xf32> to vector<5x5xbf16>
    %cst_37 = arith.constant dense<0.000000e+00> : vector<5x8xf32>
    %95 = tpu.matmul %94, %79, %cst_37 {dimension_numbers = #tpu.dot_dimension_numbers<[1], [0], [0], [1], [0, 0, 1, 1], [], []>} : vector<5x5xbf16>, vector<5x8xbf16>, vector<5x8xf32> -> vector<5x8xf32>
    %96 = vector.extract_strided_slice %26 {offsets = [0, 24], sizes = [5, 8], strides = [1, 1]} : vector<5x32xf32> to vector<5x8xf32>
    %97 = arith.truncf %96 : vector<5x8xf32> to vector<5x8xbf16>
    %98 = vector.extract_strided_slice %27 {offsets = [0, 24], sizes = [5, 8], strides = [1, 1]} : vector<5x32xf32> to vector<5x8xf32>
    %99 = arith.truncf %98 : vector<5x8xf32> to vector<5x8xbf16>
    %100 = vector.extract_strided_slice %28 {offsets = [0, 24], sizes = [5, 8], strides = [1, 1]} : vector<5x32xf32> to vector<5x8xf32>
    %101 = arith.truncf %100 : vector<5x8xf32> to vector<5x8xbf16>
    %cst_38 = arith.constant dense<0.000000e+00> : vector<5x5xf32>
    %102 = tpu.matmul %97, %99, %cst_38 {dimension_numbers = #tpu.dot_dimension_numbers<[1], [1], [0], [0], [0, 0, 1, 0], [], []>} : vector<5x8xbf16>, vector<5x8xbf16>, vector<5x5xf32> -> vector<5x5xf32>
    %c3 = arith.constant 3 : index
    %c0_39 = arith.constant 0 : index
    %c0_40 = arith.constant 0 : index
    %103 = vector.load %arg4[%c3, %c0_39, %c0_40] : memref<4x5x5xf32, #tpu.memory_space<vmem>>, vector<1x5x5xf32>
    %104 = vector.shape_cast %103 : vector<1x5x5xf32> to vector<5x5xf32>
    %105 = arith.addf %102, %104 : vector<5x5xf32>
    %cst_41 = arith.constant dense<0xFF800000> : vector<5xf32>
    %106 = vector.multi_reduction <maximumf>, %105, %cst_41 [1] : vector<5x5xf32> to vector<5xf32>
    %107 = vector.shape_cast %106 : vector<5xf32> to vector<5x1xf32>
    %108 = vector.broadcast %107 : vector<5x1xf32> to vector<5x5xf32>
    %109 = arith.subf %105, %108 : vector<5x5xf32>
    %110 = math.exp %109 : vector<5x5xf32>
    %cst_42 = arith.constant dense<0.000000e+00> : vector<5xf32>
    %111 = vector.multi_reduction <add>, %110, %cst_42 [1] : vector<5x5xf32> to vector<5xf32>
    %112 = vector.shape_cast %111 : vector<5xf32> to vector<5x1xf32>
    %113 = tpu.reciprocal %112 {approx = true} : vector<5x1xf32> -> vector<5x1xf32>
    %114 = vector.broadcast %113 : vector<5x1xf32> to vector<5x5xf32>
    %115 = arith.mulf %110, %114 : vector<5x5xf32>
    %116 = arith.truncf %115 : vector<5x5xf32> to vector<5x5xbf16>
    %cst_43 = arith.constant dense<0.000000e+00> : vector<5x8xf32>
    %117 = tpu.matmul %116, %101, %cst_43 {dimension_numbers = #tpu.dot_dimension_numbers<[1], [0], [0], [1], [0, 0, 1, 1], [], []>} : vector<5x5xbf16>, vector<5x8xbf16>, vector<5x8xf32> -> vector<5x8xf32>
    %118 = tpu.concatenate %51, %73, %95, %117 in 1 : vector<5x8xf32>, vector<5x8xf32>, vector<5x8xf32>, vector<5x8xf32> -> vector<5x32xf32>
    %119 = arith.truncf %118 : vector<5x32xf32> to vector<5x32xbf16>
    %cst_44 = arith.constant dense<0.000000e+00> : vector<5x32xf32>
    %120 = tpu.matmul %119, %29, %cst_44 {dimension_numbers = #tpu.dot_dimension_numbers<[1], [0], [0], [1], [0, 0, 1, 1], [], []>} : vector<5x32xbf16>, vector<32x32xbf16>, vector<5x32xf32> -> vector<5x32xf32>
    %121 = arith.addf %1, %120 : vector<5x32xf32>
    %c0_45 = arith.constant 0 : index
    %c0_46 = arith.constant 0 : index
    %122 = vector.load %arg8[%c0_45, %c0_46] : memref<1x32xf32, #tpu.memory_space<vmem>>, vector<1x32xf32>
    %123 = arith.mulf %121, %121 : vector<5x32xf32>
    %cst_47 = arith.constant dense<0.000000e+00> : vector<5xf32>
    %124 = vector.multi_reduction <add>, %123, %cst_47 [1] : vector<5x32xf32> to vector<5xf32>
    %125 = vector.shape_cast %124 : vector<5xf32> to vector<5x1xf32>
    %cst_48 = arith.constant 3.200000e+01 : f32
    %126 = vector.broadcast %cst_48 : f32 to vector<5x1xf32>
    %127 = arith.divf %125, %126 : vector<5x1xf32>
    %cst_49 = arith.constant 9.99999997E-7 : f32
    %128 = vector.broadcast %cst_49 : f32 to vector<5x1xf32>
    %129 = arith.addf %127, %128 : vector<5x1xf32>
    %130 = math.rsqrt %129 : vector<5x1xf32>
    %131 = vector.broadcast %130 : vector<5x1xf32> to vector<5x32xf32>
    %132 = arith.mulf %121, %131 : vector<5x32xf32>
    %133 = vector.broadcast %122 : vector<1x32xf32> to vector<5x32xf32>
    %134 = arith.mulf %132, %133 : vector<5x32xf32>
    %135 = arith.truncf %134 : vector<5x32xf32> to vector<5x32xbf16>
    %c0_50 = arith.constant 0 : index
    %c0_51 = arith.constant 0 : index
    %136 = vector.load %arg9[%c0_50, %c0_51] : memref<32x32xbf16, #tpu.memory_space<vmem>>, vector<32x32xbf16>
    %cst_52 = arith.constant dense<0.000000e+00> : vector<5x32xf32>
    %137 = tpu.matmul %135, %136, %cst_52 {dimension_numbers = #tpu.dot_dimension_numbers<[1], [0], [0], [1], [0, 0, 1, 1], [], []>} : vector<5x32xbf16>, vector<32x32xbf16>, vector<5x32xf32> -> vector<5x32xf32>
    %138 = arith.truncf %3 : vector<8x32xf32> to vector<8x32xbf16>
    %c0_53 = arith.constant 0 : index
    %c0_54 = arith.constant 0 : index
    %139 = vector.load %arg10[%c0_53, %c0_54] : memref<32x64xbf16, #tpu.memory_space<vmem>>, vector<32x64xbf16>
    %cst_55 = arith.constant dense<0.000000e+00> : vector<8x64xf32>
    %140 = tpu.matmul %138, %139, %cst_55 {dimension_numbers = #tpu.dot_dimension_numbers<[1], [0], [0], [1], [0, 0, 1, 1], [], []>} : vector<8x32xbf16>, vector<32x64xbf16>, vector<8x64xf32> -> vector<8x64xf32>
    %141 = vector.extract_strided_slice %140 {offsets = [0, 0], sizes = [8, 32], strides = [1, 1]} : vector<8x64xf32> to vector<8x32xf32>
    %142 = vector.extract_strided_slice %140 {offsets = [0, 32], sizes = [8, 32], strides = [1, 1]} : vector<8x64xf32> to vector<8x32xf32>
    %c0_56 = arith.constant 0 : index
    %c0_57 = arith.constant 0 : index
    %143 = vector.load %arg11[%c0_56, %c0_57] : memref<32x32xbf16, #tpu.memory_space<vmem>>, vector<32x32xbf16>
    %144 = vector.extract_strided_slice %137 {offsets = [0, 0], sizes = [5, 8], strides = [1, 1]} : vector<5x32xf32> to vector<5x8xf32>
    %145 = arith.truncf %144 : vector<5x8xf32> to vector<5x8xbf16>
    %146 = vector.extract_strided_slice %141 {offsets = [0, 0], sizes = [8, 8], strides = [1, 1]} : vector<8x32xf32> to vector<8x8xf32>
    %147 = arith.truncf %146 : vector<8x8xf32> to vector<8x8xbf16>
    %148 = vector.extract_strided_slice %142 {offsets = [0, 0], sizes = [8, 8], strides = [1, 1]} : vector<8x32xf32> to vector<8x8xf32>
    %149 = arith.truncf %148 : vector<8x8xf32> to vector<8x8xbf16>
    %cst_58 = arith.constant dense<0.000000e+00> : vector<5x8xf32>
    %150 = tpu.matmul %145, %147, %cst_58 {dimension_numbers = #tpu.dot_dimension_numbers<[1], [1], [0], [0], [0, 0, 1, 0], [], []>} : vector<5x8xbf16>, vector<8x8xbf16>, vector<5x8xf32> -> vector<5x8xf32>
    %151 = vector.broadcast %9 : vector<1x8xf32> to vector<5x8xf32>
    %152 = arith.addf %150, %151 : vector<5x8xf32>
    %cst_59 = arith.constant dense<0xFF800000> : vector<5xf32>
    %153 = vector.multi_reduction <maximumf>, %152, %cst_59 [1] : vector<5x8xf32> to vector<5xf32>
    %154 = vector.shape_cast %153 : vector<5xf32> to vector<5x1xf32>
    %155 = vector.broadcast %154 : vector<5x1xf32> to vector<5x8xf32>
    %156 = arith.subf %152, %155 : vector<5x8xf32>
    %157 = math.exp %156 : vector<5x8xf32>
    %cst_60 = arith.constant dense<0.000000e+00> : vector<5xf32>
    %158 = vector.multi_reduction <add>, %157, %cst_60 [1] : vector<5x8xf32> to vector<5xf32>
    %159 = vector.shape_cast %158 : vector<5xf32> to vector<5x1xf32>
    %160 = tpu.reciprocal %159 {approx = true} : vector<5x1xf32> -> vector<5x1xf32>
    %161 = vector.broadcast %160 : vector<5x1xf32> to vector<5x8xf32>
    %162 = arith.mulf %157, %161 : vector<5x8xf32>
    %163 = arith.truncf %162 : vector<5x8xf32> to vector<5x8xbf16>
    %cst_61 = arith.constant dense<0.000000e+00> : vector<5x8xf32>
    %164 = tpu.matmul %163, %149, %cst_61 {dimension_numbers = #tpu.dot_dimension_numbers<[1], [0], [0], [1], [0, 0, 1, 1], [], []>} : vector<5x8xbf16>, vector<8x8xbf16>, vector<5x8xf32> -> vector<5x8xf32>
    %165 = vector.extract_strided_slice %137 {offsets = [0, 8], sizes = [5, 8], strides = [1, 1]} : vector<5x32xf32> to vector<5x8xf32>
    %166 = arith.truncf %165 : vector<5x8xf32> to vector<5x8xbf16>
    %167 = vector.extract_strided_slice %141 {offsets = [0, 8], sizes = [8, 8], strides = [1, 1]} : vector<8x32xf32> to vector<8x8xf32>
    %168 = arith.truncf %167 : vector<8x8xf32> to vector<8x8xbf16>
    %169 = vector.extract_strided_slice %142 {offsets = [0, 8], sizes = [8, 8], strides = [1, 1]} : vector<8x32xf32> to vector<8x8xf32>
    %170 = arith.truncf %169 : vector<8x8xf32> to vector<8x8xbf16>
    %cst_62 = arith.constant dense<0.000000e+00> : vector<5x8xf32>
    %171 = tpu.matmul %166, %168, %cst_62 {dimension_numbers = #tpu.dot_dimension_numbers<[1], [1], [0], [0], [0, 0, 1, 0], [], []>} : vector<5x8xbf16>, vector<8x8xbf16>, vector<5x8xf32> -> vector<5x8xf32>
    %172 = vector.broadcast %9 : vector<1x8xf32> to vector<5x8xf32>
    %173 = arith.addf %171, %172 : vector<5x8xf32>
    %cst_63 = arith.constant dense<0xFF800000> : vector<5xf32>
    %174 = vector.multi_reduction <maximumf>, %173, %cst_63 [1] : vector<5x8xf32> to vector<5xf32>
    %175 = vector.shape_cast %174 : vector<5xf32> to vector<5x1xf32>
    %176 = vector.broadcast %175 : vector<5x1xf32> to vector<5x8xf32>
    %177 = arith.subf %173, %176 : vector<5x8xf32>
    %178 = math.exp %177 : vector<5x8xf32>
    %cst_64 = arith.constant dense<0.000000e+00> : vector<5xf32>
    %179 = vector.multi_reduction <add>, %178, %cst_64 [1] : vector<5x8xf32> to vector<5xf32>
    %180 = vector.shape_cast %179 : vector<5xf32> to vector<5x1xf32>
    %181 = tpu.reciprocal %180 {approx = true} : vector<5x1xf32> -> vector<5x1xf32>
    %182 = vector.broadcast %181 : vector<5x1xf32> to vector<5x8xf32>
    %183 = arith.mulf %178, %182 : vector<5x8xf32>
    %184 = arith.truncf %183 : vector<5x8xf32> to vector<5x8xbf16>
    %cst_65 = arith.constant dense<0.000000e+00> : vector<5x8xf32>
    %185 = tpu.matmul %184, %170, %cst_65 {dimension_numbers = #tpu.dot_dimension_numbers<[1], [0], [0], [1], [0, 0, 1, 1], [], []>} : vector<5x8xbf16>, vector<8x8xbf16>, vector<5x8xf32> -> vector<5x8xf32>
    %186 = vector.extract_strided_slice %137 {offsets = [0, 16], sizes = [5, 8], strides = [1, 1]} : vector<5x32xf32> to vector<5x8xf32>
    %187 = arith.truncf %186 : vector<5x8xf32> to vector<5x8xbf16>
    %188 = vector.extract_strided_slice %141 {offsets = [0, 16], sizes = [8, 8], strides = [1, 1]} : vector<8x32xf32> to vector<8x8xf32>
    %189 = arith.truncf %188 : vector<8x8xf32> to vector<8x8xbf16>
    %190 = vector.extract_strided_slice %142 {offsets = [0, 16], sizes = [8, 8], strides = [1, 1]} : vector<8x32xf32> to vector<8x8xf32>
    %191 = arith.truncf %190 : vector<8x8xf32> to vector<8x8xbf16>
    %cst_66 = arith.constant dense<0.000000e+00> : vector<5x8xf32>
    %192 = tpu.matmul %187, %189, %cst_66 {dimension_numbers = #tpu.dot_dimension_numbers<[1], [1], [0], [0], [0, 0, 1, 0], [], []>} : vector<5x8xbf16>, vector<8x8xbf16>, vector<5x8xf32> -> vector<5x8xf32>
    %193 = vector.broadcast %9 : vector<1x8xf32> to vector<5x8xf32>
    %194 = arith.addf %192, %193 : vector<5x8xf32>
    %cst_67 = arith.constant dense<0xFF800000> : vector<5xf32>
    %195 = vector.multi_reduction <maximumf>, %194, %cst_67 [1] : vector<5x8xf32> to vector<5xf32>
    %196 = vector.shape_cast %195 : vector<5xf32> to vector<5x1xf32>
    %197 = vector.broadcast %196 : vector<5x1xf32> to vector<5x8xf32>
    %198 = arith.subf %194, %197 : vector<5x8xf32>
    %199 = math.exp %198 : vector<5x8xf32>
    %cst_68 = arith.constant dense<0.000000e+00> : vector<5xf32>
    %200 = vector.multi_reduction <add>, %199, %cst_68 [1] : vector<5x8xf32> to vector<5xf32>
    %201 = vector.shape_cast %200 : vector<5xf32> to vector<5x1xf32>
    %202 = tpu.reciprocal %201 {approx = true} : vector<5x1xf32> -> vector<5x1xf32>
    %203 = vector.broadcast %202 : vector<5x1xf32> to vector<5x8xf32>
    %204 = arith.mulf %199, %203 : vector<5x8xf32>
    %205 = arith.truncf %204 : vector<5x8xf32> to vector<5x8xbf16>
    %cst_69 = arith.constant dense<0.000000e+00> : vector<5x8xf32>
    %206 = tpu.matmul %205, %191, %cst_69 {dimension_numbers = #tpu.dot_dimension_numbers<[1], [0], [0], [1], [0, 0, 1, 1], [], []>} : vector<5x8xbf16>, vector<8x8xbf16>, vector<5x8xf32> -> vector<5x8xf32>
    %207 = vector.extract_strided_slice %137 {offsets = [0, 24], sizes = [5, 8], strides = [1, 1]} : vector<5x32xf32> to vector<5x8xf32>
    %208 = arith.truncf %207 : vector<5x8xf32> to vector<5x8xbf16>
    %209 = vector.extract_strided_slice %141 {offsets = [0, 24], sizes = [8, 8], strides = [1, 1]} : vector<8x32xf32> to vector<8x8xf32>
    %210 = arith.truncf %209 : vector<8x8xf32> to vector<8x8xbf16>
    %211 = vector.extract_strided_slice %142 {offsets = [0, 24], sizes = [8, 8], strides = [1, 1]} : vector<8x32xf32> to vector<8x8xf32>
    %212 = arith.truncf %211 : vector<8x8xf32> to vector<8x8xbf16>
    %cst_70 = arith.constant dense<0.000000e+00> : vector<5x8xf32>
    %213 = tpu.matmul %208, %210, %cst_70 {dimension_numbers = #tpu.dot_dimension_numbers<[1], [1], [0], [0], [0, 0, 1, 0], [], []>} : vector<5x8xbf16>, vector<8x8xbf16>, vector<5x8xf32> -> vector<5x8xf32>
    %214 = vector.broadcast %9 : vector<1x8xf32> to vector<5x8xf32>
    %215 = arith.addf %213, %214 : vector<5x8xf32>
    %cst_71 = arith.constant dense<0xFF800000> : vector<5xf32>
    %216 = vector.multi_reduction <maximumf>, %215, %cst_71 [1] : vector<5x8xf32> to vector<5xf32>
    %217 = vector.shape_cast %216 : vector<5xf32> to vector<5x1xf32>
    %218 = vector.broadcast %217 : vector<5x1xf32> to vector<5x8xf32>
    %219 = arith.subf %215, %218 : vector<5x8xf32>
    %220 = math.exp %219 : vector<5x8xf32>
    %cst_72 = arith.constant dense<0.000000e+00> : vector<5xf32>
    %221 = vector.multi_reduction <add>, %220, %cst_72 [1] : vector<5x8xf32> to vector<5xf32>
    %222 = vector.shape_cast %221 : vector<5xf32> to vector<5x1xf32>
    %223 = tpu.reciprocal %222 {approx = true} : vector<5x1xf32> -> vector<5x1xf32>
    %224 = vector.broadcast %223 : vector<5x1xf32> to vector<5x8xf32>
    %225 = arith.mulf %220, %224 : vector<5x8xf32>
    %226 = arith.truncf %225 : vector<5x8xf32> to vector<5x8xbf16>
    %cst_73 = arith.constant dense<0.000000e+00> : vector<5x8xf32>
    %227 = tpu.matmul %226, %212, %cst_73 {dimension_numbers = #tpu.dot_dimension_numbers<[1], [0], [0], [1], [0, 0, 1, 1], [], []>} : vector<5x8xbf16>, vector<8x8xbf16>, vector<5x8xf32> -> vector<5x8xf32>
    %228 = tpu.concatenate %164, %185, %206, %227 in 1 : vector<5x8xf32>, vector<5x8xf32>, vector<5x8xf32>, vector<5x8xf32> -> vector<5x32xf32>
    %229 = arith.truncf %228 : vector<5x32xf32> to vector<5x32xbf16>
    %cst_74 = arith.constant dense<0.000000e+00> : vector<5x32xf32>
    %230 = tpu.matmul %229, %143, %cst_74 {dimension_numbers = #tpu.dot_dimension_numbers<[1], [0], [0], [1], [0, 0, 1, 1], [], []>} : vector<5x32xbf16>, vector<32x32xbf16>, vector<5x32xf32> -> vector<5x32xf32>
    %231 = arith.addf %121, %230 : vector<5x32xf32>
    %c0_75 = arith.constant 0 : index
    %c0_76 = arith.constant 0 : index
    %232 = vector.load %arg12[%c0_75, %c0_76] : memref<1x32xf32, #tpu.memory_space<vmem>>, vector<1x32xf32>
    %233 = arith.mulf %231, %231 : vector<5x32xf32>
    %cst_77 = arith.constant dense<0.000000e+00> : vector<5xf32>
    %234 = vector.multi_reduction <add>, %233, %cst_77 [1] : vector<5x32xf32> to vector<5xf32>
    %235 = vector.shape_cast %234 : vector<5xf32> to vector<5x1xf32>
    %cst_78 = arith.constant 3.200000e+01 : f32
    %236 = vector.broadcast %cst_78 : f32 to vector<5x1xf32>
    %237 = arith.divf %235, %236 : vector<5x1xf32>
    %cst_79 = arith.constant 9.99999997E-7 : f32
    %238 = vector.broadcast %cst_79 : f32 to vector<5x1xf32>
    %239 = arith.addf %237, %238 : vector<5x1xf32>
    %240 = math.rsqrt %239 : vector<5x1xf32>
    %241 = vector.broadcast %240 : vector<5x1xf32> to vector<5x32xf32>
    %242 = arith.mulf %231, %241 : vector<5x32xf32>
    %243 = vector.broadcast %232 : vector<1x32xf32> to vector<5x32xf32>
    %244 = arith.mulf %242, %243 : vector<5x32xf32>
    %c0_80 = arith.constant 0 : index
    %c0_81 = arith.constant 0 : index
    %245 = vector.load %arg13[%c0_80, %c0_81] : memref<32x128xbf16, #tpu.memory_space<vmem>>, vector<32x128xbf16>
    %c0_82 = arith.constant 0 : index
    %c0_83 = arith.constant 0 : index
    %246 = vector.load %arg14[%c0_82, %c0_83] : memref<64x32xbf16, #tpu.memory_space<vmem>>, vector<64x32xbf16>
    %247 = arith.truncf %244 : vector<5x32xf32> to vector<5x32xbf16>
    %cst_84 = arith.constant dense<0.000000e+00> : vector<5x128xf32>
    %248 = tpu.matmul %247, %245, %cst_84 {dimension_numbers = #tpu.dot_dimension_numbers<[1], [0], [0], [1], [0, 0, 1, 1], [], []>} : vector<5x32xbf16>, vector<32x128xbf16>, vector<5x128xf32> -> vector<5x128xf32>
    %249 = vector.extract_strided_slice %248 {offsets = [0, 0], sizes = [5, 64], strides = [1, 1]} : vector<5x128xf32> to vector<5x64xf32>
    %250 = arith.mulf %249, %249 : vector<5x64xf32>
    %251 = arith.mulf %249, %250 : vector<5x64xf32>
    %cst_85 = arith.constant 4.471500e-02 : f32
    %252 = vector.broadcast %cst_85 : f32 to vector<5x64xf32>
    %253 = arith.mulf %252, %251 : vector<5x64xf32>
    %254 = arith.addf %249, %253 : vector<5x64xf32>
    %cst_86 = arith.constant 0.797884583 : f32
    %255 = vector.broadcast %cst_86 : f32 to vector<5x64xf32>
    %256 = arith.mulf %255, %254 : vector<5x64xf32>
    %257 = math.tanh %256 : vector<5x64xf32>
    %cst_87 = arith.constant 1.000000e+00 : f32
    %258 = vector.broadcast %cst_87 : f32 to vector<5x64xf32>
    %259 = arith.addf %258, %257 : vector<5x64xf32>
    %cst_88 = arith.constant 5.000000e-01 : f32
    %260 = vector.broadcast %cst_88 : f32 to vector<5x64xf32>
    %261 = arith.mulf %260, %259 : vector<5x64xf32>
    %262 = arith.mulf %249, %261 : vector<5x64xf32>
    %263 = vector.extract_strided_slice %248 {offsets = [0, 64], sizes = [5, 64], strides = [1, 1]} : vector<5x128xf32> to vector<5x64xf32>
    %264 = arith.mulf %262, %263 : vector<5x64xf32>
    %265 = arith.truncf %264 : vector<5x64xf32> to vector<5x64xbf16>
    %cst_89 = arith.constant dense<0.000000e+00> : vector<5x32xf32>
    %266 = tpu.matmul %265, %246, %cst_89 {dimension_numbers = #tpu.dot_dimension_numbers<[1], [0], [0], [1], [0, 0, 1, 1], [], []>} : vector<5x64xbf16>, vector<64x32xbf16>, vector<5x32xf32> -> vector<5x32xf32>
    %267 = arith.addf %231, %266 : vector<5x32xf32>
    %c0_90 = arith.constant 0 : index
    %c0_91 = arith.constant 0 : index
    %c0_92 = arith.constant 0 : index
    %268 = vector.load %arg15[%c0_90, %c0_91, %c0_92] : memref<1x5x32xf32, #tpu.memory_space<vmem>>, vector<1x5x32xf32>
    %269 = vector.shape_cast %268 : vector<1x5x32xf32> to vector<5x32xf32>
    %270 = vector.shape_cast %267 : vector<5x32xf32> to vector<1x5x32xf32>
    tpu.vector_store %arg15[%c0_90, %c0_91, %c0_92], %270 {strides = array<i32>} : memref<1x5x32xf32, #tpu.memory_space<vmem>>, vector<1x5x32xf32>,
    return
  }
  func.func @transform_0(%arg0: i32) -> (i32, i32, i32) {
    %c0_i32 = arith.constant 0 : i32
    %c0_i32_0 = arith.constant 0 : i32
    %c0_i32_1 = arith.constant 0 : i32
    return %arg0, %c0_i32, %c0_i32_0 : i32, i32, i32
  }
  func.func @transform_1(%arg0: i32) -> (i32, i32, i32) {
    %c0_i32 = arith.constant 0 : i32
    %c0_i32_0 = arith.constant 0 : i32
    %c0_i32_1 = arith.constant 0 : i32
    return %arg0, %c0_i32, %c0_i32_0 : i32, i32, i32
  }
  func.func @transform_2(%arg0: i32) -> (i32, i32, i32) {
    %c0_i32 = arith.constant 0 : i32
    %c0_i32_0 = arith.constant 0 : i32
    %c0_i32_1 = arith.constant 0 : i32
    return %arg0, %c0_i32, %c0_i32_0 : i32, i32, i32
  }
  func.func @transform_3(%arg0: i32) -> (i32, i32, i32) {
    %c0_i32 = arith.constant 0 : i32
    %c0_i32_0 = arith.constant 0 : i32
    %c0_i32_1 = arith.constant 0 : i32
    %c0_i32_2 = arith.constant 0 : i32
    return %c0_i32, %c0_i32_0, %c0_i32_1 : i32, i32, i32
  }
  func.func @transform_4(%arg0: i32) -> (i32, i32) {
    %c0_i32 = arith.constant 0 : i32
    %c0_i32_0 = arith.constant 0 : i32
    %c0_i32_1 = arith.constant 0 : i32
    return %c0_i32, %c0_i32_0 : i32, i32
  }
  func.func @transform_5(%arg0: i32) -> (i32, i32) {
    %c0_i32 = arith.constant 0 : i32
    %c0_i32_0 = arith.constant 0 : i32
    %c0_i32_1 = arith.constant 0 : i32
    return %c0_i32, %c0_i32_0 : i32, i32
  }
  func.func @transform_6(%arg0: i32) -> (i32, i32) {
    %c0_i32 = arith.constant 0 : i32
    %c0_i32_0 = arith.constant 0 : i32
    %c0_i32_1 = arith.constant 0 : i32
    return %c0_i32, %c0_i32_0 : i32, i32
  }
  func.func @transform_7(%arg0: i32) -> (i32, i32) {
    %c0_i32 = arith.constant 0 : i32
    %c0_i32_0 = arith.constant 0 : i32
    %c0_i32_1 = arith.constant 0 : i32
    return %c0_i32, %c0_i32_0 : i32, i32
  }
  func.func @transform_8(%arg0: i32) -> (i32, i32) {
    %c0_i32 = arith.constant 0 : i32
    %c0_i32_0 = arith.constant 0 : i32
    %c0_i32_1 = arith.constant 0 : i32
    return %c0_i32, %c0_i32_0 : i32, i32
  }
  func.func @transform_9(%arg0: i32) -> (i32, i32) {
    %c0_i32 = arith.constant 0 : i32
    %c0_i32_0 = arith.constant 0 : i32
    %c0_i32_1 = arith.constant 0 : i32
    return %c0_i32, %c0_i32_0 : i32, i32
  }
  func.func @transform_10(%arg0: i32) -> (i32, i32) {
    %c0_i32 = arith.constant 0 : i32
    %c0_i32_0 = arith.constant 0 : i32
    %c0_i32_1 = arith.constant 0 : i32
    return %c0_i32, %c0_i32_0 : i32, i32
  }
  func.func @transform_11(%arg0: i32) -> (i32, i32) {
    %c0_i32 = arith.constant 0 : i32
    %c0_i32_0 = arith.constant 0 : i32
    %c0_i32_1 = arith.constant 0 : i32
    return %c0_i32, %c0_i32_0 : i32, i32
  }
  func.func @transform_12(%arg0: i32) -> (i32, i32) {
    %c0_i32 = arith.constant 0 : i32
    %c0_i32_0 = arith.constant 0 : i32
    %c0_i32_1 = arith.constant 0 : i32
    return %c0_i32, %c0_i32_0 : i32, i32
  }
  func.func @transform_13(%arg0: i32) -> (i32, i32) {
    %c0_i32 = arith.constant 0 : i32
    %c0_i32_0 = arith.constant 0 : i32
    %c0_i32_1 = arith.constant 0 : i32
    return %c0_i32, %c0_i32_0 : i32, i32
  }
  func.func @transform_14(%arg0: i32) -> (i32, i32, i32) {
    %c0_i32 = arith.constant 0 : i32
    %c0_i32_0 = arith.constant 0 : i32
    %c0_i32_1 = arith.constant 0 : i32
    return %arg0, %c0_i32, %c0_i32_0 : i32, i32, i32
  }
}

</mosaic_0001>

<bundles_post_ra>
// kernel: generate.10
= control target key start
LH: loop header
LB: loop body
LE: loop exit
PB: predicated region body
PF: predicated region fallthrough
CT: control target
= control target key end

     0   :  { %vm16_vm0 = vcmask 261120   ;;  %v75_v6 = vmov 32.0   ;;  %s110_s0 = inlined_call_operand.vmem [shape: f32[16,32], index: 0, kind: input, shape index: {}]   ;;  %s111_s1 = inlined_call_operand.vmem [shape: f32[1,32], index: 1, kind: input, shape index: {}]   ;;  %s112_s2 = inlined_call_operand.vmem [shape: f32[16,32], index: 2, kind: output, shape index: {}]  }
   0x1   :  { %v11_v0 = vld [vmem:[%s110_s0] sm:$0xff]  ;;  %v12_v2 = vld [vmem:[%s110_s0 + $0x8] sm:$0xff]  ;;  %69 = vrcp.f32 %v75_v6 }
   0x2   :  { %v14_v1 = vmul.f32 %v11_v0, %v11_v0  ;;  %v15_v4 = vmul.f32 %v12_v2, %v12_v2  ;;  %v68_v27 = vld [vmem:[%s111_s1] ss:$0 sm:$0xff] }
   0x4   :  { %v17_v3 = vsel %vm16_vm0, %v14_v1, 0.0  ;;  %v20_v5 = vsel %vm16_vm0, %v15_v4, 0.0 }
   0x5   :  { %18 = vadd.xlane.f32.xlu0 %v17_v3 }
   0x7   :  { %v70_v7 = vpop.eup %69 }
   0x8   :  { %v24_v8 = vmul.f32 32.0, %v70_v7  ;;  %vm28_vm1 = vweird.f32 %v70_v7 }
   0xa   :  { %v25_v9 = vsub.f32 1.0, %v24_v8 }
   0xc   :  { %v26_v10 = vmul.f32 %v70_v7, %v25_v9 }
   0xd   :  { %21 = vadd.xlane.f32.xlu0 %v20_v5 }
   0xe   :  { %v27_v11 = vadd.f32 %v70_v7, %v26_v10 }
  0x10   :  { %v29_v12 = vsel %vm28_vm1, %v70_v7, %v27_v11 }
  0x78   :  { %v19_v13 = vpop.xlane.xlu0 %18 }
  0x79   :  { %v30_v14 = vmul.f32 %v29_v12, %v19_v13 }
  0x7b   :  { %v32_v15 = vadd.f32 1e-06, %v30_v14 }
  0x7d   :  { %71 = vrsqrt.f32 %v32_v15  ;;  %vm40_vm3 = vweird.f32 %v32_v15 }
  0x80   :  { %v22_v16 = vpop.xlane.xlu0 %21 }
  0x81   :  { %v31_v17 = vmul.f32 %v29_v12, %v22_v16 }
  0x83   :  { %v72_v18 = vpop.eup %71  ;;  %v33_v19 = vadd.f32 1e-06, %v31_v17 }
  0x84   :  { %v35_v20 = vmul.f32 %v72_v18, %v32_v15  ;;  %vm41_vm2 = vweird.f32 %v72_v18 }
  0x85   :  { %73 = vrsqrt.f32 %v33_v19  ;;  %vm42_vm4 = vmor %vm40_vm3, %vm41_vm2  ;;  %vm50_vm6 = vweird.f32 %v33_v19 }
  0x86   :  { %v36_v21 = vmul.f32 %v72_v18, %v35_v20 }
  0x88   :  { %v37_v22 = vmul.f32 0.5, %v36_v21 }
  0x8a   :  { %v38_v23 = vsub.f32 1.5, %v37_v22 }
  0x8b   :  { %v74_v24 = vpop.eup %73 }
  0x8c   :  { %v39_v25 = vmul.f32 %v72_v18, %v38_v23  ;;  %v45_v26 = vmul.f32 %v74_v24, %v33_v19  ;;  %vm51_vm5 = vweird.f32 %v74_v24 }
  0x8d   :  { %vm52_vm7 = vmor %vm50_vm6, %vm51_vm5 }
  0x8e   :  { %v43_v28 = vsel %vm42_vm4, %v72_v18, %v39_v25  ;;  %v46_v29 = vmul.f32 %v74_v24, %v45_v26 }
  0x8f   :  { %v54_v30 = vmul.f32 %v43_v28, %v11_v0 }
  0x90   :  { %v47_v31 = vmul.f32 0.5, %v46_v29 }
  0x91   :  { %v59_v32 = vmul.f32 %v68_v27, %v54_v30 }
  0x92   :  { %v48_v33 = vsub.f32 1.5, %v47_v31 }
  0x93   :  { %61 = vst.msk [vmem:[%s112_s2] sm:$0xff] %vm16_vm0, %v59_v32 }
  0x94   :  { %v49_v34 = vmul.f32 %v74_v24, %v48_v33 }
  0x96   :  { %v53_v35 = vsel %vm52_vm7, %v74_v24, %v49_v34 }
  0x97   :  { %v55_v36 = vmul.f32 %v53_v35, %v12_v2 }
  0x99   :  { %v60_v37 = vmul.f32 %v68_v27, %v55_v36 }
  0x9b   :  { %62 = vst.msk [vmem:[%s112_s2 + $0x8] sm:$0xff] %vm16_vm0, %v60_v37 }

// kernel: generate.7
= control target key start
LH: loop header
LB: loop body
LE: loop exit
PB: predicated region body
PF: predicated region fallthrough
CT: control target
= control target key end

     0   :  { %vm114_vm0 = vcmask 523264   ;;  %vm146_vm1 = vcmask 261120   ;;  %s283_s1 = inlined_call_operand.vmem [shape: bf16[192,32], index: 1, kind: input, shape index: {}]   ;;  %s284_s0 = inlined_call_operand.vmem [shape: f32[16,192], index: 0, kind: input, shape index: {}]   ;;  %s285_s2 = inlined_call_operand.vmem [shape: f32[16,32], index: 2, kind: output, shape index: {}]  }
   0x1   :  { %v209_v0 = vld [vmem:[%s283_s1 + $0x38] sm:$0xff]  ;;  %v208_v2 = vld [vmem:[%s283_s1 + $0x30] sm:$0xff]  ;;  %v207_v4 = vld [vmem:[%s283_s1 + $0x28] sm:$0xff] }
   0x2   :  { %v213_v1 = vld [vmem:[%s283_s1 + $0x58] sm:$0xff]  ;;  %118 = vmatpush.bf16.msra.mxu0 %v209_v0  ;;  %v212_v3 = vld [vmem:[%s283_s1 + $0x50] sm:$0xff]  ;;  %v211_v5 = vld [vmem:[%s283_s1 + $0x48] sm:$0xff] }
   0x3   :  { %136 = vmatpush.bf16.msra.mxu1 %v213_v1  ;;  %v206_v6 = vld [vmem:[%s283_s1 + $0x20] sm:$0xff]  ;;  %v13_v8 = vld [vmem:[%s284_s0 + $0x8] sm:$0xff]  ;;  %v15_v9 = vld [vmem:[%s284_s0 + $0x18] sm:$0xff] }
   0x4   :  { %v210_v7 = vld [vmem:[%s283_s1 + $0x40] sm:$0xff]  ;;  %v205_v10 = vld [vmem:[%s283_s1 + $0x18] sm:$0xff]  ;;  %v17_v11 = vpack.c.bf16 %v15_v9, %v13_v8  ;;  %v204_v12 = vld [vmem:[%s283_s1 + $0x10] sm:$0xff] }
   0x5   :  { %v203_v13 = vld [vmem:[%s283_s1 + $0x8] sm:$0xff]  ;;  %v202_v14 = vld [vmem:[%s283_s1] sm:$0xff]  ;;  %v14_v16 = vld [vmem:[%s284_s0 + $0x10] sm:$0xff] }
   0x6   :  { %119 = vmatpush.bf16.msra.mxu0 %v208_v2  ;;  %v12_v15 = vld [vmem:[%s284_s0] sm:$0xff] }
   0x7   :  { %137 = vmatpush.bf16.msra.mxu1 %v212_v3  ;;  %v16_v17 = vpack.c.bf16 %v14_v16, %v12_v15 }
   0xa   :  { %120 = vmatpush.bf16.msra.mxu0 %v207_v4 }
   0xb   :  { %138 = vmatpush.bf16.msra.mxu1 %v211_v5 }
   0xe   :  { %121 = vmatpush.bf16.msra.mxu0 %v206_v6 }
   0xf   :  { %139 = vmatpush.bf16.msra.mxu1 %v210_v7 }
  0x12   :  { %122 = vmatpush.bf16.msra.mxu0 %v205_v10  ;;  %201 = vmatmul.msk.bf16.vlgmr.msra.gmra.mxu1 %vm114_vm0, %v17_v11 }
  0x16   :  { %123 = vmatpush.bf16.msra.mxu0 %v204_v12 }
  0x1a   :  { %124 = vmatpush.bf16.msra.mxu0 %v203_v13 }
  0x1e   :  { %125 = vmatpush.bf16.msra.mxu0 %v202_v14 }
  0x21   :  { %126 = vmatmul.bf16.vlgmr.msra.gmra.mxu0 %v16_v17 }
  0x8f   :  { %v141_v18 = vpop.f32.mrf.mxu1 }
  0x97   :  { %v143_v21 = vpop.f32.mrf.mxu1 }
  0x9e   :  { %v127_v19 = vpop.f32.mrf.mxu0 }
  0x9f   :  { %v142_v20 = vadd.f32 %v141_v18, %v127_v19 }
  0xa1   :  { %147 = vst.msk [vmem:[%s285_s2] sm:$0xff] %vm146_vm1, %v142_v20 }
  0xa6   :  { %v129_v22 = vpop.f32.mrf.mxu0 }
  0xa7   :  { %v144_v23 = vadd.f32 %v143_v21, %v129_v22 }
  0xa9   :  { %148 = vst.msk [vmem:[%s285_s2 + $0x8] sm:$0xff] %vm146_vm1, %v144_v23 }

// kernel: generate.8
= control target key start
LH: loop header
LB: loop body
LE: loop exit
PB: predicated region body
PF: predicated region fallthrough
CT: control target
= control target key end

     0   :  { %s1034_s27 = smov 0   ;;  %s1155_s0 = inlined_call_operand.vmem [shape: f32[2,8,32], index: 0, kind: input, shape index: {}]   ;;  %s1156_s1 = inlined_call_operand.vmem [shape: f32[2,1,8], index: 1, kind: input, shape index: {}]   ;;  %s1157_s2 = inlined_call_operand.vmem [shape: f32[1,32], index: 2, kind: input, shape index: {}]   ;;  %s1158_s3 = inlined_call_operand.vmem [shape: bf16[32,96], index: 3, kind: input, shape index: {}]   ;;  %s1159_s4 = inlined_call_operand.vmem [shape: bf16[32,32], index: 4, kind: input, shape index: {}]   ;;  %s1160_s5 = inlined_call_operand.vmem [shape: f32[1,32], index: 5, kind: input, shape index: {}]   ;;  %s1161_s6 = inlined_call_operand.vmem [shape: bf16[32,128], index: 6, kind: input, shape index: {}]   ;;  %s1162_s7 = inlined_call_operand.vmem [shape: bf16[64,32], index: 7, kind: input, shape index: {}]   ;;  %s1163_s8 = inlined_call_operand.vmem [shape: f32[2,8,32], index: 8, kind: output, shape index: {}]  }
   0x1 LB: > { %s846_s28 = sadd.s32 4294967295, %s972_s27   ;;  %p850_p0 = scmp.ge.s32.totalorder %s972_s27, 1  ;;  %s972_s27 = sphi %s1034_s27, %s18_s27  }
   0x2   : > { %p269_p1 = scmp.lt.s32.totalorder %s972_s27, 3 }
   0x4   : > { %p270_p2 = pnand %p850_p0, %p269_p1 }
   0x5   : > { %p304_p3 = scmp.lt.s32.totalorder (!%p270_p2), %s846_s28, 1  ;;  %s975_s17 = smov (!%p270_p2), 72  }
   0x6   : > { %273 = sbr.rel (%p270_p2) target bundleno = 1747 (0x6d3), region = 52  ;;  %s976_s18 = smov (!%p270_p2), 88  }
   0x7   : > { %s977_s19 = smov (!%p270_p2), 96   ;;  %s978_s20 = smov (!%p270_p2), 104  }
   0x8   : > { %s979_s21 = smov (!%p270_p2), 120   ;;  %s980_s22 = smov (!%p270_p2), 112  }
   0x9   : > { %s981_s23 = smov (!%p270_p2), 80   ;;  %s982_s30 = smov (!%p270_p2), 64  }
   0xa   : > { %s983_s9 = smov (!%p270_p2), 40   ;;  %s985_s11 = smov (!%p270_p2), 48  }
   0xb   : > { %s1165_s28 = smov (!%p304_p3, %s846_s28), 1  ;;  %vm322_vm0 = vcmask 261120   ;;  %v974_v3 = vmov 32.0   ;;  %v908_v7 = vld [vmem:[%s1158_s3 + $0x8] sm:$0xff]  ;;  %v907_v9 = vld [vmem:[%s1158_s3] sm:$0xff]  ;;  %vm394_vm5 = vcmask 64512  }
   0xc   : > { %s851_s29 = sshll.u32 %s1165_s28, 3  ;;  %942 = vrcp.f32 %v974_v3  ;;  %376 = vmatpush.bf16.msra.mxu0 %v908_v7  ;;  %v940_v21 = vld [vmem:[%s1157_s2] ss:$0 sm:$0xff]  ;;  %s310_s26 = scalar_lea.vmem %s1156_s1, %s1165_s28  ;;  %vm431_vm6 = vcmask 1043456   ;;  %vm629_vm7 = vcmask 130048   ;;  %vm631_vm8 = vcmask 195584  }
   0xd   : > { %s307_s10 = scalar_lea.vmem %s1155_s0, %s851_s29  ;;  %v317_v40 = vld [vmem:[%s310_s26] sm:$0x1]  ;;  %s986_s12 = smov 8   ;;  %vm765_vm12 = vcmask 523264  }
   0xe   : > { %v1050_v0 = vld [vmem:[%s307_s10] sm:$0xff]  ;;  %v318_v41 = vsub.f32 1.0, %v317_v40  ;;  %s984_s10 = smov 56   ;;  %s987_s13 = smov 16  }
   0xf   : > { %v321_v1 = vmul.f32 %v1050_v0, %v1050_v0  ;;  %s988_s14 = smov 24   ;;  %s314_s16 = scalar_lea.vmem %s1163_s8, %s851_s29 }
  0x10   : > { %377 = vmatpush.bf16.msra.mxu0 %v907_v9  ;;  %v319_v42 = vmul.f32 -1e+09, %v318_v41 }
  0x11   : > { %v323_v2 = vsel %vm322_vm0, %v321_v1, 0.0 }
  0x12   : > { %324 = vadd.xlane.f32.xlu0 %v323_v2  ;;  %v943_v4 = vpop.eup %942  ;;  %v389_v43 = vperm.slane %v319_v42, 0 }
  0x13   : > { %v327_v5 = vmul.f32 32.0, %v943_v4  ;;  %vm331_vm1 = vweird.f32 %v943_v4 }
  0x15   : > { %v328_v6 = vsub.f32 1.0, %v327_v5 }
  0x17   : > { %v329_v8 = vmul.f32 %v943_v4, %v328_v6 }
  0x19   : > { %v330_v10 = vadd.f32 %v943_v4, %v329_v8 }
  0x1b   : > { %v1061_v11 = vsel %vm331_vm1, %v943_v4, %v330_v10 }
  0x85   : > { %v325_v12 = vpop.xlane.xlu0 %324 }
  0x86   : > { %v333_v13 = vmul.f32 %v1061_v11, %v325_v12 }
  0x88   : > { %v334_v14 = vadd.f32 1e-06, %v333_v13 }
  0x8a   : > { %944 = vrsqrt.f32 %v334_v14  ;;  %vm341_vm3 = vweird.f32 %v334_v14 }
  0x90   : > { %v945_v15 = vpop.eup %944 }
  0x91   : > { %v336_v16 = vmul.f32 %v945_v15, %v334_v14  ;;  %vm342_vm2 = vweird.f32 %v945_v15 }
  0x92   : > { %vm343_vm4 = vmor %vm341_vm3, %vm342_vm2 }
  0x93   : > { %v337_v17 = vmul.f32 %v945_v15, %v336_v16 }
  0x95   : > { %v338_v18 = vmul.f32 0.5, %v337_v17 }
  0x97   : > { %v339_v19 = vsub.f32 1.5, %v338_v18 }
  0x99   : > { %v340_v20 = vmul.f32 %v945_v15, %v339_v19 }
  0x9b   : > { %v344_v22 = vsel %vm343_vm4, %v945_v15, %v340_v20 }
  0x9c   : > { %v345_v23 = vmul.f32 %v344_v22, %v1050_v0 }
  0x9e   : > { %v349_v24 = vmul.f32 %v940_v21, %v345_v23 }
  0xa0   : > { %v350_v25 = vpack.c.bf16 %v349_v24, %v349_v24 }
  0xa2   : > { %861 = vmatmul.msk.bf16.vlgmr.msra.gmra.mxu0 %vm322_vm0, %v350_v25 }
 0x11f   : > { %v379_v26 = vpop.f32.mrf.mxu0 }
 0x120   : > { %v1069_v27 = vpack.c.bf16 %v379_v26, %v379_v26 }
 0x122   : > { %562 = vrot.lane.b32.xlu2 %v1069_v27, %s975_s17  ;;  %450 = vrot.lane.b32.xlu1 %v1069_v27, %s976_s18 }
 0x123   : > { %392 = vrot.lane.b32.xlu0 %v1069_v27, %s977_s19 }
 0x127   : > { %v381_v28 = vpop.f32.mrf.mxu0 }
 0x12a   : > { %560 = vrot.lane.b32.xlu2 %v1069_v27, %s978_s20  ;;  %448 = vrot.lane.b32.xlu1 %v1069_v27, %s979_s21 }
 0x132   : > { %504 = vrot.lane.b32.xlu2 %v1069_v27, %s980_s22  ;;  %506 = vrot.lane.b32.xlu1 %v1069_v27, %s981_s23 }
 0x17c   : > { %v563_v29 = vpop.permute.xlu2 %562 }
 0x17d   : > { %v568_v34 = vsel %vm394_vm5, %v563_v29, 0 }
 0x184   : > { %v561_v36 = vpop.permute.xlu2 %560 }
 0x18c   : > { %v505_v39 = vpop.permute.xlu2 %504 }
 0x194   : > { %v451_v30 = vpop.permute.xlu1 %450 }
 0x195   : > { %v393_v31 = vpop.permute.xlu0 %392  ;;  %v456_v32 = vsel %vm394_vm5, %v451_v30, 0 }
 0x196   : > { %v399_v33 = vsel %vm394_vm5, %v393_v31, 0  ;;  %465 = vmatpush.bf16.xpose.msra.mxu3 %v456_v32 }
 0x197   : > { %408 = vmatpush.bf16.xpose.msra.mxu1 %v399_v33 }
 0x19c   : > { %v449_v35 = vpop.permute.xlu1 %448 }
 0x19d   : > { %864 = vmatmul.msk.bf16.vlgmr.msra.gmra.mxu3 %vm394_vm5, %v449_v35 }
 0x19e   : > { %577 = vmatpush.bf16.xpose.msrb.mxu3 %v568_v34  ;;  %862 = vmatmul.msk.bf16.vlgmr.msra.gmra.mxu1 %vm394_vm5, %v1069_v27 }
 0x1a4   : > { %v507_v37 = vpop.permute.xlu1 %506 }
 0x1a5   : > { %v512_v38 = vsel %vm394_vm5, %v507_v37, 0 }
 0x1a6   : > { %521 = vmatpush.bf16.xpose.msrb.mxu0 %v512_v38 }
 0x1ad   : > { %866 = vmatmul.msk.bf16.vlgmr.msrb.gmra.mxu0 %vm394_vm5, %v505_v39  ;;  %868 = vmatmul.msk.bf16.vlgmr.msrb.gmra.mxu3 %vm394_vm5, %v561_v36 }
 0x21b   : > { %v410_v44 = vpop.f32.mrf.mxu1 }
 0x21c   : > { %v411_v45 = vadd.f32 %v410_v44, %v389_v43 }
 0x21e   : > { %v414_v46 = vsel %vm394_vm5, %v411_v45, -inf }
 0x21f   : > { %415 = vmax.xlane.f32.xlu1 %v414_v46 }
 0x220   : > { %v467_v47 = vpop.f32.mrf.mxu3 }
 0x221   : > { %v468_v48 = vadd.f32 %v467_v47, %v389_v43 }
 0x223   : > { %v412_v49 = vpop.f32.mrf.mxu1  ;;  %v471_v50 = vsel %vm394_vm5, %v468_v48, -inf }
 0x224   : > { %472 = vmax.xlane.f32.xlu2 %v471_v50  ;;  %v910_v50 = vld [vmem:[%s1159_s4 + $0x8] sm:$0xff] }
 0x225   : > { %655 = vmatpush.bf16.msra.mxu0 %v910_v50 }
 0x228   : > { %v469_v51 = vpop.f32.mrf.mxu3 }
 0x229   : > { %v909_v51 = vld [vmem:[%s1159_s4] sm:$0xff] }
 0x22a   : > { %v523_v52 = vpop.f32.mrf.mxu0  ;;  %656 = vmatpush.bf16.msra.mxu0 %v909_v51 }
 0x22b   : > { %v524_v53 = vadd.f32 %v523_v52, %v389_v43 }
 0x22d   : > { %v527_v54 = vsel %vm394_vm5, %v524_v53, -inf }
 0x22e   : > { %528 = vmax.xlane.f32.xlu2 %v527_v54 }
 0x230   : > { %v579_v55 = vpop.f32.mrf.mxu3 }
 0x231   : > { %v580_v56 = vadd.f32 %v579_v55, %v389_v43 }
 0x232   : > { %v525_v57 = vpop.f32.mrf.mxu0 }
 0x233   : > { %v583_v58 = vsel %vm394_vm5, %v580_v56, -inf }
 0x234   : > { %584 = vmax.xlane.f32.xlu0 %v583_v58 }
 0x238   : > { %v581_v59 = vpop.f32.mrf.mxu3 }
 0x248   : > { %426 = vrot.lane.b32.xlu0 %v1069_v27, %s982_s30 }
 0x250   : > { %595 = vrot.lane.b32.xlu0 %v1069_v27, %s983_s9 }
 0x292   : > { %v416_v60 = vpop.xlane.xlu1 %415 }
 0x293   : > { %v417_v61 = vsub.f32 %v411_v45, %v416_v60 }
 0x295   : > { %v418_v62 = vmul.f32 1.442695, %v417_v61 }
 0x297   : > { %946 = vpow2.f32 %v418_v62  ;;  %v473_v63 = vpop.xlane.xlu2 %472 }
 0x298   : > { %v474_v5 = vsub.f32 %v468_v48, %v473_v63 }
 0x29a   : > { %v475_v7 = vmul.f32 1.442695, %v474_v5 }
 0x29d   : > { %v947_v1 = vpop.eup %946 }
 0x29e   : > { %v420_v2 = vsel %vm394_vm5, %v947_v1, 0.0 }
 0x29f   : > { %421 = vadd.xlane.f32.xlu1 %v420_v2  ;;  %v911_v2 = vld [vmem:[%s1161_s6] sm:$0xff] }
 0x2a1   : > { %v529_v3 = vpop.xlane.xlu2 %528 }
 0x2a2   : > { %v530_v4 = vsub.f32 %v524_v53, %v529_v3 }
 0x2a4   : > { %v531_v6 = vmul.f32 1.442695, %v530_v4 }
 0x2a6   : > { %948 = vpow2.f32 %v531_v6 }
 0x2a7   : > { %v585_v8 = vpop.xlane.xlu0 %584  ;;  %950 = vpow2.f32 %v475_v7 }
 0x2a8   : > { %v586_v10 = vsub.f32 %v580_v56, %v585_v8 }
 0x2aa   : > { %v587_v13 = vmul.f32 1.442695, %v586_v10 }
 0x2ac   : > { %v949_v9 = vpop.eup %948  ;;  %952 = vpow2.f32 %v587_v13 }
 0x2ad   : > { %v533_v12 = vsel %vm394_vm5, %v949_v9, 0.0  ;;  %v951_v14 = vpop.eup %950 }
 0x2ae   : > { %534 = vadd.xlane.f32.xlu2 %v533_v12  ;;  %v477_v15 = vsel %vm394_vm5, %v951_v14, 0.0  ;;  %v941_v12 = vld [vmem:[%s1160_s5] ss:$0 sm:$0xff] }
 0x2b2   : > { %v953_v16 = vpop.eup %952 }
 0x2b3   : > { %v589_v19 = vsel %vm394_vm5, %v953_v16, 0.0 }
 0x2b6   : > { %478 = vadd.xlane.f32.xlu2 %v477_v15 }
 0x2b8   : > { %483 = vrot.lane.b32.xlu1 %v1069_v27, %s984_s10 }
 0x2ba   : > { %v427_v17 = vpop.permute.xlu0 %426 }
 0x2bb   : > { %v433_v18 = vsel %vm431_vm6, %v427_v17, 0  ;;  %v915_v17 = vld [vmem:[%s1162_s7 + $0x10] sm:$0xff] }
 0x2bc   : > { %442 = vmatpush.bf16.msra.mxu2 %v433_v18  ;;  %v914_v18 = vld [vmem:[%s1162_s7 + $0x8] sm:$0xff] }
 0x2be   : > { %590 = vadd.xlane.f32.xlu2 %v589_v19 }
 0x2c2   : > { %v596_v25 = vpop.permute.xlu0 %595 }
 0x2c3   : > { %v601_v30 = vsel %vm431_vm6, %v596_v25, 0 }
 0x2d6   : > { %539 = vrot.lane.b32.xlu2 %v1069_v27, %s985_s11 }
 0x312   : > { %v422_v20 = vpop.xlane.xlu1 %421 }
 0x313   : > { %954 = vrcp.f32 %v422_v20 }
 0x319   : > { %v955_v21 = vpop.eup %954 }
 0x31a   : > { %v424_v22 = vmul.f32 %v955_v21, %v947_v1  ;;  %v912_v1 = vld [vmem:[%s1161_s6 + $0x8] sm:$0xff] }
 0x31c   : > { %v425_v23 = vpack.c.bf16 %v424_v22, %v424_v22 }
 0x31e   : > { %863 = vmatmul.msk.bf16.vlgmr.msra.gmra.mxu2 %vm394_vm5, %v425_v23  ;;  %v913_v23 = vld [vmem:[%s1162_s7] sm:$0xff] }
 0x321   : > { %v535_v24 = vpop.xlane.xlu2 %534 }
 0x329   : > { %v479_v26 = vpop.xlane.xlu2 %478 }
 0x32a   : > { %v484_v28 = vpop.permute.xlu1 %483  ;;  %956 = vrcp.f32 %v479_v26 }
 0x32b   : > { %v489_v29 = vsel %vm431_vm6, %v484_v28, 0  ;;  %958 = vrcp.f32 %v535_v24 }
 0x32c   : > { %498 = vmatpush.bf16.msrb.mxu2 %v489_v29 }
 0x330   : > { %610 = vmatpush.bf16.msra.mxu2 %v601_v30  ;;  %v957_v27 = vpop.eup %956 }
 0x331   : > { %v481_v31 = vmul.f32 %v957_v27, %v951_v14  ;;  %v591_v32 = vpop.xlane.xlu2 %590  ;;  %v959_v34 = vpop.eup %958 }
 0x332   : > { %960 = vrcp.f32 %v591_v32  ;;  %v537_v35 = vmul.f32 %v959_v34, %v949_v9 }
 0x333   : > { %v482_v33 = vpack.c.bf16 %v481_v31, %v481_v31 }
 0x334   : > { %v538_v39 = vpack.c.bf16 %v537_v35, %v537_v35 }
 0x335   : > { %865 = vmatmul.msk.bf16.vlgmr.msrb.gmra.mxu2 %vm394_vm5, %v482_v33 }
 0x338   : > { %v961_v38 = vpop.eup %960 }
 0x339   : > { %v540_v36 = vpop.permute.xlu2 %539  ;;  %v593_v40 = vmul.f32 %v961_v38, %v953_v16 }
 0x33a   : > { %v545_v37 = vsel %vm431_vm6, %v540_v36, 0 }
 0x33b   : > { %554 = vmatpush.bf16.msrb.mxu1 %v545_v37  ;;  %v594_v41 = vpack.c.bf16 %v593_v40, %v593_v40 }
 0x33e   : > { %867 = vmatmul.msk.bf16.vlgmr.msrb.gmra.mxu1 %vm394_vm5, %v538_v39 }
 0x33f   : > { %719 = vmatpush.bf16.msra.mxu1 %v912_v1 }
 0x343   : > { %720 = vmatpush.bf16.msra.mxu1 %v911_v2 }
 0x345   : > { %869 = vmatmul.msk.bf16.vlgmr.msra.gmra.mxu2 %vm394_vm5, %v594_v41 }
 0x3a1   : > { %v444_v42 = vpop.f32.mrf.mxu2 }
 0x3a9   : > { %v446_v43 = vpop.f32.mrf.mxu2 }
 0x3b8   : > { %v500_v44 = vpop.f32.mrf.mxu2 }
 0x3b9   : > { %617 = vrot.lane.b32.xlu0 %v500_v44, %s986_s12 }
 0x3bb   : > { %v556_v45 = vpop.f32.mrf.mxu1 }
 0x3bc   : > { %621 = vrot.lane.b32.xlu1 %v556_v45, %s987_s13 }
 0x3c0   : > { %v502_v46 = vpop.f32.mrf.mxu2 }
 0x3c3   : > { %v558_v47 = vpop.f32.mrf.mxu1 }
 0x3c8   : > { %v612_v48 = vpop.f32.mrf.mxu2 }
 0x3c9   : > { %625 = vrot.lane.b32.xlu0 %v612_v48, %s988_s14 }
 0x3d0   : > { %v614_v49 = vpop.f32.mrf.mxu2 }
 0x42b   : > { %v618_v52 = vpop.permute.xlu0 %617 }
 0x42c   : > { %v628_v54 = vsel %vm394_vm5, %v444_v42, %v618_v52 }
 0x42e   : > { %v622_v53 = vpop.permute.xlu1 %621 }
 0x42f   : > { %v630_v55 = vsel %vm629_vm7, %v628_v54, %v622_v53 }
 0x43b   : > { %v626_v56 = vpop.permute.xlu0 %625 }
 0x43c   : > { %v632_v57 = vsel %vm631_vm8, %v630_v55, %v626_v56 }
 0x43d   : > { %v633_v58 = vpack.c.bf16 %v632_v57, %v632_v57 }
 0x43f   : > { %878 = vmatmul.msk.bf16.vlgmr.msra.gmra.mxu0 %vm322_vm0, %v633_v58 }
 0x4bc   : > { %v658_v59 = vpop.f32.mrf.mxu0 }
 0x4bd   : > { %v662_v60 = vadd.f32 %v658_v59, %v1050_v0 }
 0x4bf   : > { %v664_v61 = vmul.f32 %v662_v60, %v662_v60 }
 0x4c1   : > { %v665_v62 = vsel %vm322_vm0, %v664_v61, 0.0 }
 0x4c2   : > { %666 = vadd.xlane.f32.xlu1 %v665_v62 }
 0x4c4   : > { %v660_v63 = vpop.f32.mrf.mxu0 }
 0x535   : > { %v667_v3 = vpop.xlane.xlu1 %666 }
 0x536   : > { %v668_v4 = vmul.f32 %v667_v3, %v1061_v11  ;;  %v916_v11 = vld [vmem:[%s1162_s7 + $0x18] sm:$0xff] }
 0x537   : > { %773 = vmatpush.bf16.msra.mxu3 %v916_v11 }
 0x538   : > { %v669_v5 = vadd.f32 1e-06, %v668_v4 }
 0x53a   : > { %962 = vrsqrt.f32 %v669_v5  ;;  %vm676_vm10 = vweird.f32 %v669_v5 }
 0x53b   : > { %774 = vmatpush.bf16.msra.mxu3 %v915_v17 }
 0x53f   : > { %775 = vmatpush.bf16.msra.mxu3 %v914_v18 }
 0x540   : > { %v963_v0 = vpop.eup %962 }
 0x541   : > { %v671_v6 = vmul.f32 %v963_v0, %v669_v5  ;;  %vm677_vm9 = vweird.f32 %v963_v0 }
 0x542   : > { %vm678_vm11 = vmor %vm676_vm10, %vm677_vm9 }
 0x543   : > { %v672_v7 = vmul.f32 %v963_v0, %v671_v6  ;;  %776 = vmatpush.bf16.msra.mxu3 %v913_v23 }
 0x545   : > { %v673_v8 = vmul.f32 0.5, %v672_v7 }
 0x547   : > { %v674_v9 = vsub.f32 1.5, %v673_v8 }
 0x549   : > { %v675_v10 = vmul.f32 %v963_v0, %v674_v9 }
 0x54b   : > { %v679_v13 = vsel %vm678_vm11, %v963_v0, %v675_v10 }
 0x54c   : > { %v680_v14 = vmul.f32 %v679_v13, %v662_v60 }
 0x54e   : > { %v684_v15 = vmul.f32 %v941_v12, %v680_v14 }
 0x550   : > { %v697_v16 = vpack.c.bf16 %v684_v15, %v684_v15 }
 0x552   : > { %887 = vmatmul.msk.bf16.vlgmr.msra.gmra.mxu1 %vm322_vm0, %v697_v16 }
 0x5cf   : > { %v722_v19 = vpop.f32.mrf.mxu1 }
 0x5d0   : > { %736 = vrot.lane.b32.xlu0 %v722_v19, %s982_s30  ;;  %v726_v21 = vmul.f32 %v722_v19, %v722_v19 }
 0x5d2   : > { %v727_v22 = vmul.f32 %v726_v21, %v722_v19 }
 0x5d4   : > { %v728_v24 = vmul.f32 0.044715, %v727_v22 }
 0x5d6   : > { %v729_v25 = vadd.f32 %v728_v24, %v722_v19 }
 0x5d7   : > { %v724_v20 = vpop.f32.mrf.mxu1 }
 0x5d8   : > { %v730_v26 = vmul.f32 0.7978846, %v729_v25 }
 0x5da   : > { %964 = vtanh.f32 %v730_v26 }
 0x5e0   : > { %v965_v28 = vpop.eup %964 }
 0x5e1   : > { %v732_v29 = vadd.f32 1.0, %v965_v28 }
 0x5e3   : > { %v733_v30 = vmul.f32 0.5, %v732_v29 }
 0x5e5   : > { %v734_v27 = vmul.f32 %v733_v30, %v722_v19 }
 0x642   : > { %v737_v31 = vpop.permute.xlu0 %736 }
 0x643   : > { %v739_v32 = vmul.f32 %v737_v31, %v734_v27 }
 0x645   : > { %v740_v33 = vpack.c.bf16 %v739_v32, %v739_v32 }
 0x647   : > { %904 = vmatmul.msk.bf16.vlgmr.msra.gmra.mxu3 %vm765_vm12, %v740_v33 }
 0x6ca   : > { %v778_v34 = vpop.f32.mrf.mxu3 }
 0x6cb   : > { %v782_v35 = vadd.f32 %v778_v34, %v662_v60 }
 0x6cd   : > { %783 = vst.msk [vmem:[%s314_s16] sm:$0xff] %vm322_vm0, %v782_v35 }
 0x6d2   : > { %v780_v36 = vpop.f32.mrf.mxu3 }
 0x6d3 PF: > { %s18_s27 = sadd.s32 1, %s972_s27  }
 0x6d4   : > { %p15_p4 = scmp.ge.s32.totalorder %s18_s27, 4  }
 0x6d6   :  { %17 = sbr.rel (!%p15_p4) target bundleno = 1 (0x1), region = 85 }

// kernel: closed_call.38
= control target key start
LH: loop header
LB: loop body
LE: loop exit
PB: predicated region body
PF: predicated region fallthrough
CT: control target
= control target key end

     0   :  { %vm20_vm0 = vcmask 261120   ;;  %vm24_vm1 = vcmask 254976   ;;  %v127_v6 = vmov 32.0   ;;  %vm100_vm9 = vcmask 523264   ;;  %s171_s0 = inlined_call_operand.vmem [shape: f32[10,32], index: 0, kind: input, shape index: {}]   ;;  %s172_s1 = inlined_call_operand.vmem [shape: f32[1,32], index: 1, kind: input, shape index: {}]   ;;  %s173_s2 = inlined_call_operand.vmem [shape: bf16[32,64], index: 2, kind: input, shape index: {}]   ;;  %s174_s3 = inlined_call_operand.vmem [shape: f32[10,64], index: 3, kind: output, shape index: {}]  }
   0x1   :  { %v15_v0 = vld [vmem:[%s171_s0] sm:$0xff]  ;;  %v16_v2 = vld [vmem:[%s171_s0 + $0x8] sm:$0x3]  ;;  %121 = vrcp.f32 %v127_v6  ;;  %vm102_vm10 = vcmask 517120  }
   0x2   :  { %v18_v1 = vmul.f32 %v15_v0, %v15_v0  ;;  %v19_v4 = vmul.f32 %v16_v2, %v16_v2  ;;  %v118_v12 = vld [vmem:[%s173_s2 + $0x8] sm:$0xff]  ;;  %v117_v14 = vld [vmem:[%s173_s2] sm:$0xff] }
   0x3   :  { %92 = vmatpush.bf16.msra.mxu0 %v118_v12  ;;  %v120_v35 = vld [vmem:[%s172_s1] ss:$0 sm:$0xff] }
   0x4   :  { %v21_v3 = vsel %vm20_vm0, %v18_v1, 0.0  ;;  %v25_v5 = vsel %vm24_vm1, %v19_v4, 0.0 }
   0x5   :  { %22 = vadd.xlane.f32.xlu0 %v21_v3 }
   0x7   :  { %v122_v7 = vpop.eup %121  ;;  %93 = vmatpush.bf16.msra.mxu0 %v117_v14 }
   0x8   :  { %v29_v8 = vmul.f32 32.0, %v122_v7  ;;  %vm33_vm2 = vweird.f32 %v122_v7 }
   0xa   :  { %v30_v9 = vsub.f32 1.0, %v29_v8 }
   0xc   :  { %v31_v10 = vmul.f32 %v122_v7, %v30_v9 }
   0xd   :  { %26 = vadd.xlane.f32.xlu0 %v25_v5 }
   0xe   :  { %v32_v11 = vadd.f32 %v122_v7, %v31_v10 }
  0x10   :  { %v34_v13 = vsel %vm33_vm2, %v122_v7, %v32_v11 }
  0x78   :  { %v23_v15 = vpop.xlane.xlu0 %22 }
  0x79   :  { %v35_v16 = vmul.f32 %v34_v13, %v23_v15 }
  0x7b   :  { %v37_v17 = vadd.f32 1e-06, %v35_v16 }
  0x7d   :  { %123 = vrsqrt.f32 %v37_v17  ;;  %vm45_vm4 = vweird.f32 %v37_v17 }
  0x80   :  { %v27_v18 = vpop.xlane.xlu0 %26 }
  0x81   :  { %v36_v19 = vmul.f32 %v34_v13, %v27_v18 }
  0x83   :  { %v124_v20 = vpop.eup %123  ;;  %v38_v21 = vadd.f32 1e-06, %v36_v19 }
  0x84   :  { %v40_v22 = vmul.f32 %v124_v20, %v37_v17  ;;  %vm46_vm3 = vweird.f32 %v124_v20 }
  0x85   :  { %125 = vrsqrt.f32 %v38_v21  ;;  %vm47_vm5 = vmor %vm45_vm4, %vm46_vm3  ;;  %vm55_vm7 = vweird.f32 %v38_v21 }
  0x86   :  { %v41_v23 = vmul.f32 %v124_v20, %v40_v22 }
  0x88   :  { %v42_v24 = vmul.f32 0.5, %v41_v23 }
  0x8a   :  { %v43_v25 = vsub.f32 1.5, %v42_v24 }
  0x8b   :  { %v126_v26 = vpop.eup %125 }
  0x8c   :  { %v50_v27 = vmul.f32 %v126_v26, %v38_v21  ;;  %v44_v28 = vmul.f32 %v124_v20, %v43_v25  ;;  %vm56_vm6 = vweird.f32 %v126_v26 }
  0x8d   :  { %vm57_vm8 = vmor %vm55_vm7, %vm56_vm6 }
  0x8e   :  { %v51_v29 = vmul.f32 %v126_v26, %v50_v27  ;;  %v48_v31 = vsel %vm47_vm5, %v124_v20, %v44_v28 }
  0x8f   :  { %v59_v34 = vmul.f32 %v48_v31, %v15_v0 }
  0x90   :  { %v52_v30 = vmul.f32 0.5, %v51_v29 }
  0x91   :  { %v64_v38 = vmul.f32 %v120_v35, %v59_v34 }
  0x92   :  { %v53_v32 = vsub.f32 1.5, %v52_v30 }
  0x94   :  { %v54_v33 = vmul.f32 %v126_v26, %v53_v32 }
  0x96   :  { %v58_v36 = vsel %vm57_vm8, %v126_v26, %v54_v33 }
  0x97   :  { %v60_v37 = vmul.f32 %v58_v36, %v16_v2 }
  0x99   :  { %v65_v39 = vmul.f32 %v120_v35, %v60_v37 }
  0x9b   :  { %v66_v40 = vpack.c.bf16 %v65_v39, %v64_v38 }
  0x9d   :  { %116 = vmatmul.msk.bf16.vlgmr.msra.gmra.mxu0 %vm20_vm0, %v66_v40 }
 0x11a   :  { %v95_v41 = vpop.f32.mrf.mxu0 }
 0x11b   :  { %101 = vst.msk [vmem:[%s174_s3] sm:$0xff] %vm100_vm9, %v95_v41 }
 0x122   :  { %v97_v42 = vpop.f32.mrf.mxu0 }
 0x123   :  { %103 = vst.msk [vmem:[%s174_s3 + $0x8] sm:$0x3] %vm102_vm10, %v97_v42 }

// kernel: closed_call.36
= control target key start
LH: loop header
LB: loop body
LE: loop exit
PB: predicated region body
PF: predicated region fallthrough
CT: control target
= control target key end

     0   :  { %s1698_s29 = smov 0   ;;  %s1925_s0 = inlined_call_operand.vmem [shape: f32[2,5,32], index: 0, kind: input, shape index: {}]   ;;  %s1926_s1 = inlined_call_operand.vmem [shape: f32[2,8,32], index: 1, kind: input, shape index: {}]   ;;  %s1927_s2 = inlined_call_operand.vmem [shape: f32[2,1,8], index: 2, kind: input, shape index: {}]   ;;  %s1928_s3 = inlined_call_operand.vmem [shape: f32[4,5,5], index: 3, kind: input, shape index: {}]   ;;  %s1929_s4 = inlined_call_operand.vmem [shape: f32[1,32], index: 4, kind: input, shape index: {}]   ;;  %s1930_s5 = inlined_call_operand.vmem [shape: bf16[32,96], index: 5, kind: input, shape index: {}]   ;;  %s1931_s6 = inlined_call_operand.vmem [shape: bf16[32,32], index: 6, kind: input, shape index: {}]   ;;  %s1932_s7 = inlined_call_operand.vmem [shape: f32[1,32], index: 7, kind: input, shape index: {}]   ;;  %s1933_s8 = inlined_call_operand.vmem [shape: bf16[32,32], index: 8, kind: input, shape index: {}]   ;;  %s1934_s9 = inlined_call_operand.vmem [shape: bf16[32,64], index: 9, kind: input, shape index: {}]   ;;  %s1935_s10 = inlined_call_operand.vmem [shape: bf16[32,32], index: 10, kind: input, shape index: {}]   ;;  %s1936_s11 = inlined_call_operand.vmem [shape: f32[1,32], index: 11, kind: input, shape index: {}]   ;;  %s1937_s12 = inlined_call_operand.vmem [shape: bf16[32,128], index: 12, kind: input, shape index: {}]   ;;  %s1938_s13 = inlined_call_operand.vmem [shape: bf16[64,32], index: 13, kind: input, shape index: {}]   ;;  %s1939_s14 = inlined_call_operand.vmem [shape: f32[2,5,32], index: 14, kind: output, shape index: {}]  }
   0x1 LB: > { %s1414_s30 = sadd.s32 4294967295, %s1605_s29   ;;  %p1418_p0 = scmp.ge.s32.totalorder %s1605_s29, 1  ;;  %s1605_s29 = sphi %s1698_s29, %s24_s29  }
   0x2   : > { %p428_p1 = scmp.lt.s32.totalorder %s1605_s29, 3 }
   0x4   : > { %p429_p2 = pnand %p1418_p0, %p428_p1 }
   0x5   : > { %p479_p3 = scmp.lt.s32.totalorder (!%p429_p2), %s1414_s30, 1  ;;  %s1608_s25 = smov (!%p429_p2), 72  }
   0x6   : > { %432 = sbr.rel (%p429_p2) target bundleno = 2913 (0xb61), region = 76  ;;  %s1609_s26 = smov (!%p429_p2), 88  }
   0x7   : > { %s1610_s27 = smov (!%p429_p2), 96   ;;  %s1611_s28 = smov (!%p429_p2), 104  }
   0x8   : > { %s1612_s16 = smov (!%p429_p2), 120   ;;  %s1613_s17 = smov (!%p429_p2), 112  }
   0x9   : > { %s1940_s21 = smov (!%p429_p2), 64   ;;  %s1616_s22 = smov (!%p429_p2), 40  }
   0xa   : > { %s1618_s23 = smov (!%p429_p2), 56   ;;  %s1619_s24 = smov (!%p429_p2), 48  }
   0xb   : > { %s1951_s30 = smov (!%p479_p3, %s1414_s30), 1  ;;  %vm502_vm0 = vcmask 258048   ;;  %v1607_v3 = vmov 32.0   ;;  %v1515_v7 = vld [vmem:[%s1930_s5 + $0x8] sm:$0xff]  ;;  %v1514_v9 = vld [vmem:[%s1930_s5] sm:$0xff]  ;;  %vm547_vm5 = vcmask 261120  }
   0xc   : > { %s1709_s15 = sshll.u32 %s1951_s30, 3  ;;  %1557 = vrcp.f32 %v1607_v3  ;;  %557 = vmatpush.bf16.msra.mxu0 %v1515_v7  ;;  %v1554_v21 = vld [vmem:[%s1929_s4] ss:$0 sm:$0xff]  ;;  %vm573_vm6 = vcmask 64512   ;;  %vm593_vm7 = vcmask 36864   ;;  %vm612_vm8 = vcmask 1041408  }
   0xd   : > { %s482_s18 = scalar_lea.vmem %s1925_s0, %s1709_s15  ;;  %v569_v40 = vld [vmem:[%s1928_s3] sm:$0x1f]  ;;  %v1433_v44 = vld [vmem:[%s1928_s3 + $0x8] sm:$0x1f]  ;;  %v1436_v50 = vld [vmem:[%s1928_s3 + $0x10] sm:$0x1f] }
   0xe   : > { %v1715_v0 = vld [vmem:[%s482_s18] sm:$0x1f]  ;;  %s1941_s18 = smov 80   ;;  %v1439_v54 = vld [vmem:[%s1928_s3 + $0x18] sm:$0x1f]  ;;  %vm613_vm9 = vcmask 1042432  }
   0xf   : > { %v501_v1 = vmul.f32 %v1715_v0, %v1715_v0  ;;  %vm608_vm10 = vcmask 39936   ;;  %s1944_s19 = smov 8   ;;  %s1943_s20 = smov 16   ;;  %vm819_vm11 = vcmask 130048   ;;  %vm821_vm12 = vcmask 195584  }
  0x10   : > { %558 = vmatpush.bf16.msra.mxu0 %v1514_v9 }
  0x11   : > { %v503_v2 = vsel %vm502_vm0, %v501_v1, 0.0 }
  0x12   : > { %504 = vadd.xlane.f32.xlu0 %v503_v2  ;;  %v1558_v4 = vpop.eup %1557 }
  0x13   : > { %v507_v5 = vmul.f32 32.0, %v1558_v4  ;;  %vm511_vm1 = vweird.f32 %v1558_v4 }
  0x15   : > { %v508_v6 = vsub.f32 1.0, %v507_v5 }
  0x17   : > { %v509_v8 = vmul.f32 %v1558_v4, %v508_v6 }
  0x19   : > { %v510_v10 = vadd.f32 %v1558_v4, %v509_v8 }
  0x1b   : > { %v1726_v11 = vsel %vm511_vm1, %v1558_v4, %v510_v10  ;;  %vm969_vm1 = vcmask 61440  }
  0x85   : > { %v505_v12 = vpop.xlane.xlu0 %504 }
  0x86   : > { %v513_v13 = vmul.f32 %v1726_v11, %v505_v12 }
  0x88   : > { %v514_v14 = vadd.f32 1e-06, %v513_v13 }
  0x8a   : > { %1559 = vrsqrt.f32 %v514_v14  ;;  %vm521_vm3 = vweird.f32 %v514_v14 }
  0x90   : > { %v1560_v15 = vpop.eup %1559 }
  0x91   : > { %v516_v16 = vmul.f32 %v1560_v15, %v514_v14  ;;  %vm522_vm2 = vweird.f32 %v1560_v15 }
  0x92   : > { %vm523_vm4 = vmor %vm521_vm3, %vm522_vm2  ;;  %vm988_vm2 = vcmask 1043456  }
  0x93   : > { %v517_v17 = vmul.f32 %v1560_v15, %v516_v16  ;;  %v1617_v16 = vmov 65535  }
  0x95   : > { %v518_v18 = vmul.f32 0.5, %v517_v17  ;;  %v614_v17 = vsel %vm612_vm8, 4294967295, %v1617_v16 }
  0x97   : > { %v519_v19 = vsub.f32 1.5, %v518_v18  ;;  %v615_v18 = vsel %vm613_vm9, %v614_v17, 0 }
  0x99   : > { %v520_v20 = vmul.f32 %v1560_v15, %v519_v19 }
  0x9b   : > { %v524_v22 = vsel %vm523_vm4, %v1560_v15, %v520_v20 }
  0x9c   : > { %v525_v23 = vmul.f32 %v524_v22, %v1715_v0 }
  0x9e   : > { %v529_v24 = vmul.f32 %v1554_v21, %v525_v23 }
  0xa0   : > { %v530_v25 = vpack.c.bf16 %v529_v24, %v529_v24 }
  0xa2   : > { %1430 = vmatmul.msk.bf16.vlgmr.msra.gmra.mxu0 %vm547_vm5, %v530_v25 }
 0x11f   : > { %v560_v26 = vpop.f32.mrf.mxu0 }
 0x120   : > { %v1734_v27 = vpack.c.bf16 %v560_v26, %v560_v26 }
 0x122   : > { %752 = vrot.lane.b32.xlu2 %v1734_v27, %s1608_s25  ;;  %636 = vrot.lane.b32.xlu1 %v1734_v27, %s1609_s26 }
 0x123   : > { %571 = vrot.lane.b32.xlu0 %v1734_v27, %s1610_s27 }
 0x127   : > { %v562_v28 = vpop.f32.mrf.mxu0 }
 0x12a   : > { %750 = vrot.lane.b32.xlu2 %v1734_v27, %s1611_s28  ;;  %634 = vrot.lane.b32.xlu1 %v1734_v27, %s1612_s16 }
 0x132   : > { %692 = vrot.lane.b32.xlu2 %v1734_v27, %s1613_s17  ;;  %694 = vrot.lane.b32.xlu1 %v1734_v27, %s1941_s18  ;;  %s486_s18 = scalar_lea.vmem %s1926_s1, %s1709_s15 }
 0x17c   : > { %v753_v29 = vpop.permute.xlu2 %752 }
 0x17d   : > { %v758_v34 = vsel %vm573_vm6, %v753_v29, 0 }
 0x184   : > { %v751_v36 = vpop.permute.xlu2 %750 }
 0x18c   : > { %v693_v39 = vpop.permute.xlu2 %692 }
 0x194   : > { %v637_v30 = vpop.permute.xlu1 %636 }
 0x195   : > { %v572_v31 = vpop.permute.xlu0 %571  ;;  %v642_v32 = vsel %vm573_vm6, %v637_v30, 0 }
 0x196   : > { %v578_v33 = vsel %vm573_vm6, %v572_v31, 0  ;;  %651 = vmatpush.bf16.xpose.msra.mxu3 %v642_v32 }
 0x197   : > { %587 = vmatpush.bf16.xpose.msra.mxu1 %v578_v33 }
 0x19c   : > { %v635_v35 = vpop.permute.xlu1 %634 }
 0x19d   : > { %1434 = vmatmul.msk.bf16.vlgmr.msra.gmra.mxu3 %vm573_vm6, %v635_v35 }
 0x19e   : > { %767 = vmatpush.bf16.xpose.msrb.mxu3 %v758_v34  ;;  %1431 = vmatmul.msk.bf16.vlgmr.msra.gmra.mxu1 %vm573_vm6, %v1734_v27 }
 0x1a4   : > { %v695_v37 = vpop.permute.xlu1 %694 }
 0x1a5   : > { %v700_v38 = vsel %vm573_vm6, %v695_v37, 0 }
 0x1a6   : > { %709 = vmatpush.bf16.xpose.msrb.mxu0 %v700_v38 }
 0x1ad   : > { %1437 = vmatmul.msk.bf16.vlgmr.msrb.gmra.mxu0 %vm573_vm6, %v693_v39  ;;  %1440 = vmatmul.msk.bf16.vlgmr.msrb.gmra.mxu3 %vm573_vm6, %v751_v36 }
 0x21b   : > { %v589_v41 = vpop.f32.mrf.mxu1 }
 0x21c   : > { %v590_v42 = vadd.f32 %v589_v41, %v569_v40 }
 0x21e   : > { %v594_v43 = vsel %vm593_vm7, %v590_v42, -inf }
 0x21f   : > { %595 = vmax.xlane.f32.xlu1 %v594_v43 }
 0x220   : > { %v653_v45 = vpop.f32.mrf.mxu3 }
 0x221   : > { %v654_v46 = vadd.f32 %v1433_v44, %v653_v45 }
 0x223   : > { %v591_v47 = vpop.f32.mrf.mxu1  ;;  %v657_v48 = vsel %vm593_vm7, %v654_v46, -inf }
 0x224   : > { %658 = vmax.xlane.f32.xlu2 %v657_v48 }
 0x228   : > { %v655_v49 = vpop.f32.mrf.mxu3 }
 0x22a   : > { %v711_v51 = vpop.f32.mrf.mxu0 }
 0x22b   : > { %v712_v52 = vadd.f32 %v1436_v50, %v711_v51 }
 0x22d   : > { %v715_v53 = vsel %vm593_vm7, %v712_v52, -inf }
 0x22e   : > { %716 = vmax.xlane.f32.xlu2 %v715_v53  ;;  %v1517_v53 = vld [vmem:[%s1931_s6 + $0x8] sm:$0xff] }
 0x22f   : > { %845 = vmatpush.bf16.msra.mxu0 %v1517_v53 }
 0x230   : > { %v769_v55 = vpop.f32.mrf.mxu3 }
 0x231   : > { %v770_v56 = vadd.f32 %v1439_v54, %v769_v55  ;;  %v1516_v54 = vld [vmem:[%s1931_s6] sm:$0xff] }
 0x232   : > { %v713_v57 = vpop.f32.mrf.mxu0 }
 0x233   : > { %v773_v58 = vsel %vm593_vm7, %v770_v56, -inf  ;;  %846 = vmatpush.bf16.msra.mxu0 %v1516_v54 }
 0x234   : > { %774 = vmax.xlane.f32.xlu0 %v773_v58 }
 0x238   : > { %v771_v59 = vpop.f32.mrf.mxu3 }
 0x248   : > { %606 = vrot.lane.b32.xlu0 %v1734_v27, %s1940_s21  ;;  %s489_s21 = scalar_lea.vmem %s1927_s2, %s1951_s30  ;;  %s1945_s30 = smov 80  }
 0x250   : > { %785 = vrot.lane.b32.xlu0 %v1734_v27, %s1616_s22  ;;  %s1942_s22 = smov 24  }
 0x292   : > { %v596_v60 = vpop.xlane.xlu1 %595 }
 0x293   : > { %v597_v61 = vsub.f32 %v590_v42, %v596_v60 }
 0x295   : > { %v598_v62 = vmul.f32 1.442695, %v597_v61 }
 0x297   : > { %1561 = vpow2.f32 %v598_v62  ;;  %v659_v63 = vpop.xlane.xlu2 %658  ;;  %v1521_v62 = vld [vmem:[%s1934_s9 + $0x8] sm:$0xff] }
 0x298   : > { %v660_v5 = vsub.f32 %v654_v46, %v659_v63  ;;  %v496_v63 = vld [vmem:[%s486_s18] sm:$0xff]  ;;  %934 = vmatpush.bf16.msra.mxu3 %v1521_v62 }
 0x29a   : > { %v661_v7 = vmul.f32 1.442695, %v660_v5 }
 0x29d   : > { %v1562_v1 = vpop.eup %1561 }
 0x29e   : > { %v600_v2 = vsel %vm593_vm7, %v1562_v1, 0.0 }
 0x29f   : > { %601 = vadd.xlane.f32.xlu1 %v600_v2  ;;  %v908_v2 = vpack.c.bf16 %v496_v63, %v496_v63 }
 0x2a1   : > { %v717_v3 = vpop.xlane.xlu2 %716 }
 0x2a2   : > { %v718_v4 = vsub.f32 %v712_v52, %v717_v3 }
 0x2a4   : > { %v719_v6 = vmul.f32 1.442695, %v718_v4 }
 0x2a6   : > { %1563 = vpow2.f32 %v719_v6 }
 0x2a7   : > { %v775_v8 = vpop.xlane.xlu0 %774  ;;  %1565 = vpow2.f32 %v661_v7 }
 0x2a8   : > { %v776_v10 = vsub.f32 %v770_v56, %v775_v8  ;;  %v1519_v8 = vld [vmem:[%s1933_s8 + $0x8] sm:$0xff] }
 0x2aa   : > { %v777_v13 = vmul.f32 1.442695, %v776_v10 }
 0x2ac   : > { %v1564_v9 = vpop.eup %1563  ;;  %1567 = vpow2.f32 %v777_v13 }
 0x2ad   : > { %v721_v12 = vsel %vm593_vm7, %v1564_v9, 0.0  ;;  %v1566_v14 = vpop.eup %1565 }
 0x2ae   : > { %722 = vadd.xlane.f32.xlu2 %v721_v12  ;;  %v663_v15 = vsel %vm593_vm7, %v1566_v14, 0.0 }
 0x2b2   : > { %v1568_v19 = vpop.eup %1567 }
 0x2b3   : > { %v779_v22 = vsel %vm593_vm7, %v1568_v19, 0.0 }
 0x2b6   : > { %664 = vadd.xlane.f32.xlu2 %v663_v15 }
 0x2b8   : > { %669 = vrot.lane.b32.xlu1 %v1734_v27, %s1618_s23  ;;  %s1949_s23 = smov 64  }
 0x2ba   : > { %v607_v20 = vpop.permute.xlu0 %606 }
 0x2bb   : > { %v617_v21 = vand.u32 %v615_v18, %v607_v20 }
 0x2bd   : > { %626 = vmatpush.bf16.msra.mxu2 %v617_v21 }
 0x2be   : > { %780 = vadd.xlane.f32.xlu2 %v779_v22 }
 0x2c2   : > { %v786_v29 = vpop.permute.xlu0 %785 }
 0x2c3   : > { %v791_v33 = vand.u32 %v786_v29, %v615_v18 }
 0x2d6   : > { %727 = vrot.lane.b32.xlu2 %v1734_v27, %s1619_s24 }
 0x312   : > { %v602_v23 = vpop.xlane.xlu1 %601 }
 0x313   : > { %1569 = vrcp.f32 %v602_v23  ;;  %v1555_v23 = vld [vmem:[%s1932_s7] ss:$0 sm:$0xff] }
 0x319   : > { %v1570_v24 = vpop.eup %1569 }
 0x31a   : > { %v604_v25 = vmul.f32 %v1570_v24, %v1562_v1  ;;  %v1520_v1 = vld [vmem:[%s1934_s9] sm:$0xff] }
 0x31b   : > { %935 = vmatpush.bf16.msra.mxu3 %v1520_v1 }
 0x31c   : > { %v605_v26 = vpack.c.bf16 %v604_v25, %v604_v25 }
 0x31e   : > { %1432 = vmatmul.msk.bf16.vlgmr.msra.gmra.mxu2 %vm608_vm10, %v605_v26  ;;  %1468 = vmatmul.msk.bf16.vlgmr.msra.gmra.mxu3 %vm547_vm5, %v908_v2 }
 0x321   : > { %v723_v28 = vpop.xlane.xlu2 %722 }
 0x329   : > { %v665_v30 = vpop.xlane.xlu2 %664 }
 0x32a   : > { %v670_v31 = vpop.permute.xlu1 %669  ;;  %1571 = vrcp.f32 %v665_v30 }
 0x32b   : > { %v675_v32 = vand.u32 %v670_v31, %v615_v18  ;;  %1573 = vrcp.f32 %v723_v28 }
 0x32d   : > { %684 = vmatpush.bf16.msrb.mxu2 %v675_v32 }
 0x330   : > { %v1572_v34 = vpop.eup %1571 }
 0x331   : > { %800 = vmatpush.bf16.msra.mxu2 %v791_v33  ;;  %v667_v27 = vmul.f32 %v1572_v34, %v1566_v14  ;;  %v781_v35 = vpop.xlane.xlu2 %780  ;;  %v1574_v37 = vpop.eup %1573 }
 0x332   : > { %1575 = vrcp.f32 %v781_v35  ;;  %v725_v38 = vmul.f32 %v1574_v37, %v1564_v9  ;;  %v1518_v9 = vld [vmem:[%s1933_s8] sm:$0xff] }
 0x333   : > { %v668_v36 = vpack.c.bf16 %v667_v27, %v667_v27 }
 0x334   : > { %v726_v42 = vpack.c.bf16 %v725_v38, %v725_v38 }
 0x335   : > { %1435 = vmatmul.msk.bf16.vlgmr.msrb.gmra.mxu2 %vm608_vm10, %v668_v36 }
 0x338   : > { %v1576_v41 = vpop.eup %1575 }
 0x339   : > { %v728_v39 = vpop.permute.xlu2 %727  ;;  %v783_v43 = vmul.f32 %v1576_v41, %v1568_v19 }
 0x33a   : > { %v733_v40 = vand.u32 %v728_v39, %v615_v18 }
 0x33b   : > { %v784_v44 = vpack.c.bf16 %v783_v43, %v783_v43 }
 0x33c   : > { %742 = vmatpush.bf16.msrb.mxu1 %v733_v40  ;;  %v497_v40 = vld [vmem:[%s489_s21] sm:$0x1] }
 0x33d   : > { %v498_v41 = vsub.f32 1.0, %v497_v40 }
 0x33f   : > { %1438 = vmatmul.msk.bf16.vlgmr.msrb.gmra.mxu1 %vm608_vm10, %v726_v42  ;;  %v499_v42 = vmul.f32 -1e+09, %v498_v41 }
 0x340   : > { %901 = vmatpush.bf16.msra.mxu1 %v1519_v8 }
 0x341   : > { %v948_v43 = vperm.slane %v499_v42, 0 }
 0x344   : > { %902 = vmatpush.bf16.msra.mxu1 %v1518_v9 }
 0x345   : > { %1441 = vmatmul.msk.bf16.vlgmr.msra.gmra.mxu2 %vm608_vm10, %v784_v44 }
 0x3a1   : > { %v628_v45 = vpop.f32.mrf.mxu2  ;;  %v937_v10 = vpop.f32.mrf.mxu3 }
 0x3a9   : > { %v630_v46 = vpop.f32.mrf.mxu2  ;;  %v939_v16 = vpop.f32.mrf.mxu3 }
 0x3b8   : > { %v686_v47 = vpop.f32.mrf.mxu2 }
 0x3b9   : > { %807 = vrot.lane.b32.xlu0 %v686_v47, %s1944_s19 }
 0x3bc   : > { %v744_v48 = vpop.f32.mrf.mxu1 }
 0x3bd   : > { %811 = vrot.lane.b32.xlu1 %v744_v48, %s1943_s20 }
 0x3c0   : > { %v688_v49 = vpop.f32.mrf.mxu2 }
 0x3c4   : > { %v746_v50 = vpop.f32.mrf.mxu1 }
 0x3c8   : > { %v802_v51 = vpop.f32.mrf.mxu2 }
 0x3c9   : > { %815 = vrot.lane.b32.xlu0 %v802_v51, %s1942_s22 }
 0x3d0   : > { %v804_v52 = vpop.f32.mrf.mxu2 }
 0x42b   : > { %v808_v55 = vpop.permute.xlu0 %807 }
 0x42c   : > { %v818_v57 = vsel %vm573_vm6, %v628_v45, %v808_v55 }
 0x42f   : > { %v812_v56 = vpop.permute.xlu1 %811 }
 0x430   : > { %v820_v58 = vsel %vm819_vm11, %v818_v57, %v812_v56 }
 0x43b   : > { %v816_v59 = vpop.permute.xlu0 %815 }
 0x43c   : > { %v822_v60 = vsel %vm821_vm12, %v820_v58, %v816_v59 }
 0x43d   : > { %v823_v61 = vpack.c.bf16 %v822_v60, %v822_v60 }
 0x43f   : > { %1450 = vmatmul.msk.bf16.vlgmr.msra.gmra.mxu0 %vm547_vm5, %v823_v61 }
 0x4bc   : > { %v848_v3 = vpop.f32.mrf.mxu0 }
 0x4bd   : > { %v1813_v4 = vadd.f32 %v848_v3, %v1715_v0  ;;  %v1824_v0 = vpack.c.bf16 %v937_v10, %v937_v10 }
 0x4bf   : > { %v854_v5 = vmul.f32 %v1813_v4, %v1813_v4  ;;  %1008 = vrot.lane.b32.xlu0 %v1824_v0, %s1612_s16  ;;  %v954_v13 = vsel %vm573_vm6, %v1824_v0, 0 }
 0x4c0   : > { %963 = vmatpush.bf16.xpose.msrb.mxu2 %v954_v13 }
 0x4c1   : > { %v855_v6 = vsel %vm502_vm0, %v854_v5, 0.0 }
 0x4c2   : > { %856 = vadd.xlane.f32.xlu1 %v855_v6 }
 0x4c4   : > { %v850_v7 = vpop.f32.mrf.mxu0 }
 0x4c7   : > { %1064 = vrot.lane.b32.xlu0 %v1824_v0, %s1613_s17 }
 0x531   : > { %v1009_v29 = vpop.permute.xlu0 %1008 }
 0x532   : > { %v1014_v30 = vsel %vm573_vm6, %v1009_v29, 0 }
 0x533   : > { %1023 = vmatpush.bf16.xpose.msrb.mxu1 %v1014_v30 }
 0x535   : > { %v857_v12 = vpop.xlane.xlu1 %856 }
 0x536   : > { %v858_v14 = vmul.f32 %v857_v12, %v1726_v11 }
 0x538   : > { %v859_v15 = vadd.f32 1e-06, %v858_v14 }
 0x539   : > { %v1065_v31 = vpop.permute.xlu0 %1064 }
 0x53a   : > { %1577 = vrsqrt.f32 %v859_v15  ;;  %vm866_vm14 = vweird.f32 %v859_v15  ;;  %v1070_v32 = vsel %vm573_vm6, %v1065_v31, 0 }
 0x53b   : > { %1079 = vmatpush.bf16.xpose.msra.mxu2 %v1070_v32 }
 0x540   : > { %v1578_v17 = vpop.eup %1577 }
 0x541   : > { %v861_v18 = vmul.f32 %v1578_v17, %v859_v15  ;;  %vm867_vm13 = vweird.f32 %v1578_v17 }
 0x542   : > { %vm868_vm15 = vmor %vm866_vm14, %vm867_vm13 }
 0x543   : > { %v862_v19 = vmul.f32 %v1578_v17, %v861_v18 }
 0x545   : > { %v863_v20 = vmul.f32 0.5, %v862_v19 }
 0x547   : > { %v864_v21 = vsub.f32 1.5, %v863_v20 }
 0x549   : > { %v865_v22 = vmul.f32 %v1578_v17, %v864_v21 }
 0x54b   : > { %v869_v24 = vsel %vm868_vm15, %v1578_v17, %v865_v22 }
 0x54c   : > { %v870_v25 = vmul.f32 %v869_v24, %v1813_v4 }
 0x54e   : > { %v874_v26 = vmul.f32 %v1555_v23, %v870_v25 }
 0x550   : > { %v875_v28 = vpack.c.bf16 %v874_v26, %v874_v26 }
 0x552   : > { %1459 = vmatmul.msk.bf16.vlgmr.msra.gmra.mxu1 %vm547_vm5, %v875_v28 }
 0x5cf   : > { %v904_v33 = vpop.f32.mrf.mxu1 }
 0x5d0   : > { %v945_v34 = vpack.c.bf16 %v904_v33, %v904_v33 }
 0x5d2   : > { %1062 = vrot.lane.b32.xlu0 %v945_v34, %s1613_s17  ;;  %1006 = vrot.lane.b32.xlu2 %v945_v34, %s1612_s16  ;;  %s493_s16 = scalar_lea.vmem %s1939_s14, %s1709_s15 }
 0x5d3   : > { %1469 = vmatmul.msk.bf16.vlgmr.msrb.gmra.mxu2 %vm573_vm6, %v945_v34 }
 0x5d7   : > { %v906_v27 = vpop.f32.mrf.mxu1 }
 0x5da   : > { %1120 = vrot.lane.b32.xlu2 %v1824_v0, %s1611_s28 }
 0x5e2   : > { %1118 = vrot.lane.b32.xlu2 %v945_v34, %s1611_s28 }
 0x62c   : > { %v1007_v35 = vpop.permute.xlu2 %1006 }
 0x62d   : > { %1471 = vmatmul.msk.bf16.vlgmr.msrb.gmra.mxu1 %vm573_vm6, %v1007_v35 }
 0x634   : > { %v1121_v36 = vpop.permute.xlu2 %1120 }
 0x635   : > { %v1126_v37 = vsel %vm573_vm6, %v1121_v36, 0 }
 0x636   : > { %1135 = vmatpush.bf16.xpose.msra.mxu1 %v1126_v37 }
 0x63c   : > { %v1119_v38 = vpop.permute.xlu2 %1118 }
 0x63d   : > { %1475 = vmatmul.msk.bf16.vlgmr.msra.gmra.mxu1 %vm573_vm6, %v1119_v38 }
 0x644   : > { %v1063_v39 = vpop.permute.xlu0 %1062 }
 0x645   : > { %1473 = vmatmul.msk.bf16.vlgmr.msra.gmra.mxu2 %vm573_vm6, %v1063_v39 }
 0x656   : > { %v965_v44 = vpop.f32.mrf.mxu2 }
 0x657   : > { %v966_v45 = vadd.f32 %v965_v44, %v948_v43 }
 0x659   : > { %v970_v46 = vsel %vm969_vm1, %v966_v45, -inf }
 0x65a   : > { %971 = vmax.xlane.f32.xlu2 %v970_v46 }
 0x65e   : > { %v967_v47 = vpop.f32.mrf.mxu2 }
 0x6aa   : > { %v1025_v48 = vpop.f32.mrf.mxu1 }
 0x6ab   : > { %v1026_v49 = vadd.f32 %v1025_v48, %v948_v43 }
 0x6ad   : > { %v1029_v50 = vsel %vm969_vm1, %v1026_v49, -inf }
 0x6ae   : > { %1030 = vmax.xlane.f32.xlu0 %v1029_v50  ;;  %v1523_v50 = vld [vmem:[%s1935_s10 + $0x8] sm:$0xff] }
 0x6af   : > { %1211 = vmatpush.bf16.msrb.mxu2 %v1523_v50 }
 0x6b2   : > { %v1027_v51 = vpop.f32.mrf.mxu1 }
 0x6b3   : > { %v1522_v51 = vld [vmem:[%s1935_s10] sm:$0xff] }
 0x6b4   : > { %1212 = vmatpush.bf16.msrb.mxu2 %v1522_v51 }
 0x6ba   : > { %v1137_v52 = vpop.f32.mrf.mxu1 }
 0x6bb   : > { %v1138_v59 = vadd.f32 %v1137_v52, %v948_v43 }
 0x6bd   : > { %v1141_v62 = vsel %vm969_vm1, %v1138_v59, -inf }
 0x6c2   : > { %v1139_v53 = vpop.f32.mrf.mxu1  ;;  %1041 = vrot.lane.b32.xlu0 %v1824_v0, %s1609_s26  ;;  %s1947_s26 = smov 16  }
 0x6c8   : > { %v1081_v54 = vpop.f32.mrf.mxu2 }
 0x6c9   : > { %v1082_v55 = vadd.f32 %v1081_v54, %v948_v43 }
 0x6ca   : > { %1153 = vrot.lane.b32.xlu0 %v1824_v0, %s1608_s25  ;;  %s1946_s25 = smov 8  }
 0x6cb   : > { %v1085_v56 = vsel %vm969_vm1, %v1082_v55, -inf }
 0x6cc   : > { %1086 = vmax.xlane.f32.xlu1 %v1085_v56 }
 0x6cd   : > { %v972_v57 = vpop.xlane.xlu2 %971 }
 0x6ce   : > { %v973_v58 = vsub.f32 %v966_v45, %v972_v57 }
 0x6d0   : > { %v974_v60 = vmul.f32 1.442695, %v973_v58  ;;  %v1083_v61 = vpop.f32.mrf.mxu2 }
 0x6d2   : > { %1579 = vpow2.f32 %v974_v60 }
 0x6d4   : > { %1142 = vmax.xlane.f32.xlu1 %v1141_v62 }
 0x6d8   : > { %v1580_v63 = vpop.eup %1579 }
 0x6d9   : > { %v976_v1 = vsel %vm969_vm1, %v1580_v63, 0.0 }
 0x6dc   : > { %977 = vadd.xlane.f32.xlu1 %v976_v1  ;;  %v1525_v1 = vld [vmem:[%s1937_s12 + $0x8] sm:$0xff] }
 0x721   : > { %v1031_v2 = vpop.xlane.xlu0 %1030 }
 0x722   : > { %v1032_v3 = vsub.f32 %v1026_v49, %v1031_v2  ;;  %v1524_v2 = vld [vmem:[%s1937_s12] sm:$0xff] }
 0x724   : > { %v1033_v5 = vmul.f32 1.442695, %v1032_v3 }
 0x726   : > { %1581 = vpow2.f32 %v1033_v5 }
 0x72c   : > { %v1582_v6 = vpop.eup %1581 }
 0x72d   : > { %v1035_v7 = vsel %vm969_vm1, %v1582_v6, 0.0 }
 0x72e   : > { %1036 = vadd.xlane.f32.xlu1 %v1035_v7 }
 0x734   : > { %v1042_v8 = vpop.permute.xlu0 %1041 }
 0x735   : > { %v1047_v9 = vsel %vm988_vm2, %v1042_v8, 0 }
 0x736   : > { %1056 = vmatpush.bf16.msrb.mxu3 %v1047_v9 }
 0x73c   : > { %v1154_v10 = vpop.permute.xlu0 %1153 }
 0x73d   : > { %v1159_v12 = vsel %vm988_vm2, %v1154_v10, 0 }
 0x73e   : > { %1168 = vmatpush.bf16.msra.mxu3 %v1159_v12 }
 0x73f   : > { %v1087_v13 = vpop.xlane.xlu1 %1086 }
 0x740   : > { %v1088_v14 = vsub.f32 %v1082_v55, %v1087_v13  ;;  %v1556_v13 = vld [vmem:[%s1936_s11] ss:$0 sm:$0xff] }
 0x742   : > { %v1089_v15 = vmul.f32 1.442695, %v1088_v14 }
 0x744   : > { %1583 = vpow2.f32 %v1089_v15 }
 0x747   : > { %v1143_v16 = vpop.xlane.xlu1 %1142  ;;  %983 = vrot.lane.b32.xlu1 %v1824_v0, %s1610_s27  ;;  %s1948_s27 = smov 24  }
 0x748   : > { %v1144_v17 = vsub.f32 %v1138_v59, %v1143_v16 }
 0x74a   : > { %v1584_v18 = vpop.eup %1583  ;;  %v1145_v19 = vmul.f32 1.442695, %v1144_v17 }
 0x74b   : > { %v1091_v20 = vsel %vm969_vm1, %v1584_v18, 0.0 }
 0x74c   : > { %1585 = vpow2.f32 %v1145_v19  ;;  %1092 = vadd.xlane.f32.xlu2 %v1091_v20  ;;  %v1527_v19 = vld [vmem:[%s1938_s13 + $0x8] sm:$0xff] }
 0x74f   : > { %v978_v23 = vpop.xlane.xlu1 %977 }
 0x752   : > { %v1586_v21 = vpop.eup %1585 }
 0x753   : > { %v1147_v22 = vsel %vm969_vm1, %v1586_v21, 0.0 }
 0x754   : > { %1148 = vadd.xlane.f32.xlu2 %v1147_v22 }
 0x76c   : > { %1097 = vrot.lane.b32.xlu2 %v1824_v0, %s1945_s30 }
 0x7a1   : > { %v1037_v24 = vpop.xlane.xlu1 %1036 }
 0x7a2   : > { %1587 = vrcp.f32 %v1037_v24  ;;  %v1526_v24 = vld [vmem:[%s1938_s13] sm:$0xff] }
 0x7a3   : > { %1589 = vrcp.f32 %v978_v23 }
 0x7a8   : > { %v1588_v25 = vpop.eup %1587 }
 0x7a9   : > { %v1039_v26 = vmul.f32 %v1588_v25, %v1582_v6  ;;  %v1590_v29 = vpop.eup %1589 }
 0x7aa   : > { %v980_v30 = vmul.f32 %v1590_v29, %v1580_v63 }
 0x7ab   : > { %v1040_v28 = vpack.c.bf16 %v1039_v26, %v1039_v26 }
 0x7ac   : > { %v981_v33 = vpack.c.bf16 %v980_v30, %v980_v30 }
 0x7ad   : > { %1472 = vmatmul.msk.bf16.vlgmr.msrb.gmra.mxu3 %vm573_vm6, %v1040_v28 }
 0x7b9   : > { %v984_v31 = vpop.permute.xlu1 %983 }
 0x7ba   : > { %v990_v32 = vsel %vm988_vm2, %v984_v31, 0 }
 0x7bb   : > { %999 = vmatpush.bf16.msrb.mxu0 %v990_v32 }
 0x7be   : > { %1470 = vmatmul.msk.bf16.vlgmr.msrb.gmra.mxu0 %vm573_vm6, %v981_v33 }
 0x7bf   : > { %v1093_v34 = vpop.xlane.xlu2 %1092 }
 0x7c0   : > { %1591 = vrcp.f32 %v1093_v34 }
 0x7c6   : > { %v1592_v27 = vpop.eup %1591 }
 0x7c7   : > { %v1149_v0 = vpop.xlane.xlu2 %1148  ;;  %v1095_v36 = vmul.f32 %v1592_v27, %v1584_v18  ;;  %v1528_v18 = vld [vmem:[%s1938_s13 + $0x10] sm:$0xff] }
 0x7c8   : > { %1593 = vrcp.f32 %v1149_v0 }
 0x7c9   : > { %v1096_v41 = vpack.c.bf16 %v1095_v36, %v1095_v36 }
 0x7ce   : > { %v1594_v35 = vpop.eup %1593 }
 0x7cf   : > { %v1151_v37 = vmul.f32 %v1594_v35, %v1586_v21  ;;  %v1098_v38 = vpop.permute.xlu2 %1097 }
 0x7d0   : > { %v1103_v39 = vsel %vm988_vm2, %v1098_v38, 0 }
 0x7d1   : > { %v1152_v40 = vpack.c.bf16 %v1151_v37, %v1151_v37  ;;  %1112 = vmatpush.bf16.msra.mxu0 %v1103_v39 }
 0x7d3   : > { %1476 = vmatmul.msk.bf16.vlgmr.msra.gmra.mxu3 %vm573_vm6, %v1152_v40 }
 0x7d4   : > { %1474 = vmatmul.msk.bf16.vlgmr.msra.gmra.mxu0 %vm573_vm6, %v1096_v41 }
 0x7d5   : > { %1275 = vmatpush.bf16.msrb.mxu0 %v1525_v1 }
 0x7d9   : > { %1276 = vmatpush.bf16.msrb.mxu0 %v1524_v2 }
 0x830   : > { %v1058_v42 = vpop.f32.mrf.mxu3 }
 0x831   : > { %1175 = vrot.lane.b32.xlu1 %v1058_v42, %s1946_s25 }
 0x838   : > { %v1060_v43 = vpop.f32.mrf.mxu3 }
 0x83b   : > { %v1001_v44 = vpop.f32.mrf.mxu0 }
 0x843   : > { %v1003_v45 = vpop.f32.mrf.mxu0 }
 0x851   : > { %v1114_v46 = vpop.f32.mrf.mxu0 }
 0x852   : > { %1179 = vrot.lane.b32.xlu0 %v1114_v46, %s1947_s26 }
 0x856   : > { %v1170_v47 = vpop.f32.mrf.mxu3 }
 0x857   : > { %1183 = vrot.lane.b32.xlu1 %v1170_v47, %s1948_s27 }
 0x859   : > { %v1116_v48 = vpop.f32.mrf.mxu0 }
 0x85e   : > { %v1172_v49 = vpop.f32.mrf.mxu3 }
 0x8a3   : > { %v1176_v52 = vpop.permute.xlu1 %1175 }
 0x8a4   : > { %v1186_v54 = vsel %vm573_vm6, %v1001_v44, %v1176_v52 }
 0x8c4   : > { %v1180_v53 = vpop.permute.xlu0 %1179 }
 0x8c5   : > { %v1187_v55 = vsel %vm819_vm11, %v1186_v54, %v1180_v53 }
 0x8c9   : > { %v1184_v56 = vpop.permute.xlu1 %1183 }
 0x8ca   : > { %v1188_v57 = vsel %vm821_vm12, %v1187_v55, %v1184_v56 }
 0x8cb   : > { %v1189_v58 = vpack.c.bf16 %v1188_v57, %v1188_v57 }
 0x8cd   : > { %1485 = vmatmul.msk.bf16.vlgmr.msrb.gmra.mxu2 %vm547_vm5, %v1189_v58 }
 0x950   : > { %v1214_v59 = vpop.f32.mrf.mxu2 }
 0x951   : > { %v1218_v60 = vadd.f32 %v1214_v59, %v1813_v4 }
 0x953   : > { %v1220_v61 = vmul.f32 %v1218_v60, %v1218_v60 }
 0x955   : > { %v1221_v62 = vsel %vm502_vm0, %v1220_v61, 0.0 }
 0x956   : > { %1222 = vadd.xlane.f32.xlu0 %v1221_v62 }
 0x958   : > { %v1216_v63 = vpop.f32.mrf.mxu2 }
 0x9c9   : > { %v1223_v3 = vpop.xlane.xlu0 %1222 }
 0x9ca   : > { %v1224_v5 = vmul.f32 %v1223_v3, %v1726_v11  ;;  %v1529_v11 = vld [vmem:[%s1938_s13 + $0x18] sm:$0xff] }
 0x9cb   : > { %1329 = vmatpush.bf16.msrb.mxu1 %v1529_v11 }
 0x9cc   : > { %v1225_v6 = vadd.f32 1e-06, %v1224_v5 }
 0x9ce   : > { %1595 = vrsqrt.f32 %v1225_v6  ;;  %vm1232_vm4 = vweird.f32 %v1225_v6 }
 0x9cf   : > { %1330 = vmatpush.bf16.msrb.mxu1 %v1528_v18 }
 0x9d3   : > { %1331 = vmatpush.bf16.msrb.mxu1 %v1527_v19 }
 0x9d4   : > { %v1596_v4 = vpop.eup %1595 }
 0x9d5   : > { %v1227_v7 = vmul.f32 %v1596_v4, %v1225_v6  ;;  %vm1233_vm3 = vweird.f32 %v1596_v4 }
 0x9d6   : > { %vm1234_vm6 = vmor %vm1232_vm4, %vm1233_vm3 }
 0x9d7   : > { %v1228_v8 = vmul.f32 %v1596_v4, %v1227_v7  ;;  %1332 = vmatpush.bf16.msrb.mxu1 %v1526_v24 }
 0x9d9   : > { %v1229_v9 = vmul.f32 0.5, %v1228_v8 }
 0x9db   : > { %v1230_v10 = vsub.f32 1.5, %v1229_v9 }
 0x9dd   : > { %v1231_v12 = vmul.f32 %v1596_v4, %v1230_v10 }
 0x9df   : > { %v1235_v14 = vsel %vm1234_vm6, %v1596_v4, %v1231_v12 }
 0x9e0   : > { %v1236_v15 = vmul.f32 %v1235_v14, %v1218_v60 }
 0x9e2   : > { %v1240_v16 = vmul.f32 %v1556_v13, %v1236_v15 }
 0x9e4   : > { %v1253_v17 = vpack.c.bf16 %v1240_v16, %v1240_v16 }
 0x9e6   : > { %1494 = vmatmul.msk.bf16.vlgmr.msrb.gmra.mxu0 %vm547_vm5, %v1253_v17  ;;  %vm1321_vm5 = vcmask 523264  }
 0xa63   : > { %v1278_v20 = vpop.f32.mrf.mxu0 }
 0xa64   : > { %1292 = vrot.lane.b32.xlu1 %v1278_v20, %s1949_s23  ;;  %v1282_v22 = vmul.f32 %v1278_v20, %v1278_v20 }
 0xa66   : > { %v1283_v23 = vmul.f32 %v1282_v22, %v1278_v20 }
 0xa68   : > { %v1284_v25 = vmul.f32 0.044715, %v1283_v23 }
 0xa6a   : > { %v1285_v26 = vadd.f32 %v1284_v25, %v1278_v20 }
 0xa6b   : > { %v1280_v21 = vpop.f32.mrf.mxu0 }
 0xa6c   : > { %v1286_v28 = vmul.f32 0.7978846, %v1285_v26 }
 0xa6e   : > { %1597 = vtanh.f32 %v1286_v28 }
 0xa74   : > { %v1598_v29 = vpop.eup %1597 }
 0xa75   : > { %v1288_v30 = vadd.f32 1.0, %v1598_v29 }
 0xa77   : > { %v1289_v31 = vmul.f32 0.5, %v1288_v30 }
 0xa79   : > { %v1290_v32 = vmul.f32 %v1289_v31, %v1278_v20 }
 0xad6   : > { %v1293_v33 = vpop.permute.xlu1 %1292 }
 0xad7   : > { %v1295_v34 = vmul.f32 %v1293_v33, %v1290_v32 }
 0xad9   : > { %v1296_v0 = vpack.c.bf16 %v1295_v34, %v1295_v34 }
 0xadb   : > { %1511 = vmatmul.msk.bf16.vlgmr.msrb.gmra.mxu1 %vm1321_vm5, %v1296_v0 }
 0xb58   : > { %v1334_v27 = vpop.f32.mrf.mxu1 }
 0xb59   : > { %v1338_v35 = vadd.f32 %v1334_v27, %v1218_v60 }
 0xb5b   : > { %1339 = vst.msk [vmem:[%s493_s16] sm:$0x1f] %vm502_vm0, %v1338_v35 }
 0xb60   : > { %v1336_v36 = vpop.f32.mrf.mxu1 }
 0xb61 PF: > { %s24_s29 = sadd.s32 1, %s1605_s29  }
 0xb62   : > { %p21_p4 = scmp.ge.s32.totalorder %s24_s29, 4  }
 0xb64   :  { %23 = sbr.rel (!%p21_p4) target bundleno = 1 (0x1), region = 115 }

</bundles_post_ra>
